<compile_context>
chip_gen: v5e
topology: v5e:2x2
jax: 0.10.0
libtpu: 0.0.40
codegen_flags: <defaults>
</compile_context>

<pallas_src>
import functools

import jax
import jax.numpy as jnp
from jax.experimental import pallas as pl
from jax.experimental.pallas import tpu as pltpu

_EPS = 1e-5
_LANE = 128


def _round_up(x, m):
    return (x + m - 1) // m * m


# ----------------------------------------------------------------------------
# Fused Pallas kernel: expand(1x1)+bn1+relu6 -> dw3x3+bn2+relu6 -> proj(1x1)+bn3
#                      (+ shortcut: identity or 1x1 conv+bn)
# ----------------------------------------------------------------------------
def _block_kernel(*refs, shortcut):
    if shortcut == "conv":
        (xa_ref, xb_ref, xs_ref, w1_ref, w2_ref, b2_ref, w3_ref, wsc_ref,
         out_ref, win_ref) = refs
    elif shortcut == "identity":
        (xa_ref, xb_ref, xs_ref, w1_ref, w2_ref, b2_ref, w3_ref,
         out_ref, win_ref) = refs
        wsc_ref = None
    else:  # "none"
        xa_ref, xb_ref, w1_ref, w2_ref, b2_ref, w3_ref, out_ref, win_ref = refs
        xs_ref = wsc_ref = None

    _, th, wp, cin_p = xa_ref.shape           # strip of th rows, padded width wp
    cmid_p = w1_ref.shape[1]
    wf = out_ref.shape[2]                     # lane-dense (padded) output width
    cout_p = out_ref.shape[3]

    # --- stage 1: expand (1x1 conv; bn1 scale/bias folded into w1 via the
    #     indicator channel, so zero-padded border pixels stay exactly 0) + relu6
    def expand(x3d):                          # (rows, wp, cin_p) -> (rows, wp, cmid_p)
        rows = x3d.shape[0]
        y = jnp.dot(x3d.reshape(rows * wp, cin_p), w1_ref[...],
                    preferred_element_type=jnp.float32)
        return jnp.clip(y, 0.0, 6.0).reshape(rows, wp, cmid_p)

    # window = th rows from block t  +  2 halo rows from block t+1
    win_ref[pl.ds(0, th), :, :] = expand(xa_ref[0])
    win_ref[pl.ds(th, 2), :, :] = expand(xb_ref[0, pl.ds(0, 2), :, :])

    # --- stage 2: depthwise 3x3 (stride-1) + bn2 + relu6  (9 shifted VMEM reads)
    acc = None
    for dy in range(3):
        for dx in range(3):
            tap = win_ref[pl.ds(dy, th), pl.ds(dx, wf), :]      # (th, wf, cmid_p)
            term = tap * w2_ref[3 * dy + dx]                    # (1,1,cmid_p) bcast
            acc = term if acc is None else acc + term
    z = jnp.clip(acc + b2_ref[...], 0.0, 6.0)
    z2 = z.reshape(th * wf, cmid_p)

    # --- stage 3: project (1x1 conv; bn3 folded via carrier channel) + shortcut
    out = jnp.dot(z2, w3_ref[...], preferred_element_type=jnp.float32)
    if shortcut == "conv":
        xs2 = xs_ref[0].reshape(th * wf, cin_p)
        out = out + jnp.dot(xs2, wsc_ref[...], preferred_element_type=jnp.float32)
    elif shortcut == "identity":
        xs2 = xs_ref[0].reshape(th * wf, cin_p)
        out = out + xs2                        # padded channel counts match
    out_ref[...] = out.reshape(1, th, wf, cout_p).astype(out_ref.dtype)


# ----------------------------------------------------------------------------
# Parameter setup (deterministic, matches nn.Module shapes)
# ----------------------------------------------------------------------------
def _bn_init(key, c):
    k = jax.random.split(key, 4)
    return {
        "gamma": 1.0 + 0.1 * jax.random.normal(k[0], (c,), jnp.float32),
        "beta": 0.1 * jax.random.normal(k[1], (c,), jnp.float32),
        "mean": 0.1 * jax.random.normal(k[2], (c,), jnp.float32),
        "var": jax.random.uniform(k[3], (c,), jnp.float32, 0.5, 1.5),
    }


def _fold_bn(bn):
    scale = bn["gamma"] / jnp.sqrt(bn["var"] + _EPS)
    bias = bn["beta"] - bn["mean"] * scale
    return scale, bias


def init_block_params(key, in_planes, out_planes, expansion, stride):
    planes = expansion * in_planes
    ks = jax.random.split(key, 8)
    params = {
        "w1": 0.2 * jax.random.normal(ks[0], (planes, in_planes, 1, 1), jnp.float32),
        "bn1": _bn_init(ks[1], planes),
        "w2": 0.2 * jax.random.normal(ks[2], (planes, 1, 3, 3), jnp.float32),
        "bn2": _bn_init(ks[3], planes),
        "w3": 0.2 * jax.random.normal(ks[4], (out_planes, planes, 1, 1), jnp.float32),
        "bn3": _bn_init(ks[5], out_planes),
    }
    if stride == 1 and in_planes != out_planes:
        params["wsc"] = 0.2 * jax.random.normal(
            ks[6], (out_planes, in_planes, 1, 1), jnp.float32)
        params["bnsc"] = _bn_init(ks[7], out_planes)
    return params


def prepare_block_params(params, stride):
    """Pre-fold BN into weights, pad channels to 128, build kernel-ready tensors.

    Channel index `in_planes` (resp. `planes`) is an indicator/carrier channel
    used to fold the conv biases into the 1x1 matmuls.
    """
    planes, in_planes = params["w1"].shape[:2]
    out_planes = params["w3"].shape[0]
    cin_p = _round_up(in_planes + 1, _LANE)
    cmid_p = _round_up(planes + 1, _LANE)
    cout_p = _round_up(out_planes + 1, _LANE)

    s1, b1 = _fold_bn(params["bn1"])
    s2, b2 = _fold_bn(params["bn2"])
    s3, b3 = _fold_bn(params["bn3"])

    w1f = jnp.zeros((cin_p, cmid_p), jnp.float32)
    w1f = w1f.at[:in_planes, :planes].set(params["w1"][:, :, 0, 0].T * s1[None, :])
    w1f = w1f.at[in_planes, :planes].set(b1)            # bias via indicator channel

    w2m = (params["w2"][:, 0].reshape(planes, 9) * s2[:, None]).T   # (9, planes)
    w2f = jnp.zeros((9, 1, 1, cmid_p), jnp.float32)
    w2f = w2f.at[:, 0, 0, :planes].set(w2m)
    b2f = jnp.zeros((1, 1, cmid_p), jnp.float32)
    b2f = b2f.at[0, 0, :planes].set(b2)
    b2f = b2f.at[0, 0, planes].set(1.0)                 # carrier channel -> 1 after clip

    w3f = jnp.zeros((cmid_p, cout_p), jnp.float32)
    w3f = w3f.at[:planes, :out_planes].set(params["w3"][:, :, 0, 0].T * s3[None, :])
    w3f = w3f.at[planes, :out_planes].set(b3)           # bn3 bias via carrier channel

    prep = dict(stride=stride, in_planes=in_planes, planes=planes,
                out_planes=out_planes, cin_p=cin_p, cmid_p=cmid_p, cout_p=cout_p,
                w1f=w1f, w2f=w2f, b2f=b2f, w3f=w3f)
    if stride == 1:
        if "wsc" in params:
            ssc, bsc = _fold_bn(params["bnsc"])
            wscf = jnp.zeros((cin_p, cout_p), jnp.float32)
            wscf = wscf.at[:in_planes, :out_planes].set(
                params["wsc"][:, :, 0, 0].T * ssc[None, :])
            wscf = wscf.at[in_planes, :out_planes].set(bsc)
            prep["wscf"] = wscf
            prep["shortcut"] = "conv"
        else:
            prep["shortcut"] = "identity"
    else:
        prep["shortcut"] = "none"
    return prep


# ----------------------------------------------------------------------------
# Block forward (fused Pallas kernel)
# ----------------------------------------------------------------------------
def block_forward_pallas(x_nchw, prep, *, tile_h=None):
    stride = prep["stride"]
    n, cin, h, w = x_nchw.shape
    assert cin == prep["in_planes"] and stride in (1, 2)
    cin_p, cmid_p, cout_p = prep["cin_p"], prep["cmid_p"], prep["cout_p"]

    # Geometry: the kernel always produces the stride-1 (full-resolution) result;
    # stride-2 is applied by subsampling the lane-dense output below.
    wf_pad = _round_up(w, 8)                         # lane/sublane-aligned out width
    if tile_h is None:
        tile_h = max(8, 512 // wf_pad)               # aim for >=512 flattened rows/strip
    th = max(2, min(int(tile_h), h))
    n_strips = -(-h // th)
    hf_pad = n_strips * th
    wp = _round_up(max(w + 2, wf_pad + 2), 8)        # padded input width (halo cols)
    hpad_total = (n_strips + 1) * th                 # extra zero block -> halo rows OK

    x_nhwc = jnp.transpose(x_nchw, (0, 2, 3, 1)).astype(jnp.float32)

    # Spatially padded, channel-padded input with the indicator channel set at
    # valid pixels (so folded biases vanish in the zero-pad border).
    xp = jnp.zeros((n, hpad_total, wp, cin_p), jnp.float32)
    xp = xp.at[:, 1:h + 1, 1:w + 1, :cin].set(x_nhwc)
    xp = xp.at[:, 1:h + 1, 1:w + 1, cin].set(1.0)

    inputs = [xp, xp]
    in_specs = [
        pl.BlockSpec((1, th, wp, cin_p), lambda nn, t: (nn, t, 0, 0)),       # strip t
        pl.BlockSpec((1, th, wp, cin_p), lambda nn, t: (nn, t + 1, 0, 0)),   # halo rows
    ]
    if prep["shortcut"] != "none":
        xs = jnp.zeros((n, hf_pad, wf_pad, cin_p), jnp.float32)
        xs = xs.at[:, :h, :w, :cin].set(x_nhwc)
        xs = xs.at[:, :h, :w, cin].set(1.0)
        inputs.append(xs)
        in_specs.append(
            pl.BlockSpec((1, th, wf_pad, cin_p), lambda nn, t: (nn, t, 0, 0)))

    inputs += [prep["w1f"], prep["w2f"], prep["b2f"], prep["w3f"]]
    in_specs += [
        pl.BlockSpec((cin_p, cmid_p), lambda nn, t: (0, 0)),            # resident
        pl.BlockSpec((9, 1, 1, cmid_p), lambda nn, t: (0, 0, 0, 0)),
        pl.BlockSpec((1, 1, cmid_p), lambda nn, t: (0, 0, 0)),
        pl.BlockSpec((cmid_p, cout_p), lambda nn, t: (0, 0)),
    ]
    if prep["shortcut"] == "conv":
        inputs.append(prep["wscf"])
        in_specs.append(pl.BlockSpec((cin_p, cout_p), lambda nn, t: (0, 0)))

    kernel = functools.partial(_block_kernel, shortcut=prep["shortcut"])

    out = pl.pallas_call(
        kernel,
        out_shape=jax.ShapeDtypeStruct((n, hf_pad, wf_pad, cout_p), jnp.float32),
        grid=(n, n_strips),
        in_specs=in_specs,
        out_specs=pl.BlockSpec((1, th, wf_pad, cout_p), lambda nn, t: (nn, t, 0, 0)),
        scratch_shapes=[pltpu.VMEM((th + 2, wp, cmid_p), jnp.float32)],
        compiler_params=pltpu.CompilerParams(
            # both axes write disjoint output tiles -> megacore-shardable on v7x
            dimension_semantics=("parallel", "parallel"),
            # explicit budget; safe on v5e/v6e (128 MiB) and v7x (64 MiB physical)
            vmem_limit_bytes=32 * 1024 * 1024),
    )(*inputs)

    # stride applied here; drop channel/spatial padding and go back to NCHW.
    out = out[:, 0:h:stride, 0:w:stride, :prep["out_planes"]]
    return jnp.transpose(out, (0, 3, 1, 2))


# ----------------------------------------------------------------------------
# Pure-JAX reference (mirrors the PyTorch forward exactly, NCHW)
# ----------------------------------------------------------------------------
def block_forward_ref(x, params, stride):
    def conv(x, w, stride=1, groups=1, padding=0):
        return jax.lax.conv_general_dilated(
            x, w, (stride, stride), [(padding, padding)] * 2,
            dimension_numbers=("NCHW", "OIHW", "NCHW"),
            feature_group_count=groups)

    def bn(x, p):
        scale = p["gamma"] / jnp.sqrt(p["var"] + _EPS)
        bias = p["beta"] - p["mean"] * scale
        return x * scale[None, :, None, None] + bias[None, :, None, None]

    planes = params["w1"].shape[0]
    out = jnp.clip(bn(conv(x, params["w1"]), params["bn1"]), 0.0, 6.0)
    out = jnp.clip(bn(conv(out, params["w2"], stride=stride, groups=planes,
                           padding=1), params["bn2"]), 0.0, 6.0)
    out = bn(conv(out, params["w3"]), params["bn3"])
    if stride == 1:
        sc = x
        if "wsc" in params:
            sc = bn(conv(x, params["wsc"]), params["bnsc"])
        out = out + sc
    return out


# ----------------------------------------------------------------------------
if __name__ == "__main__":
    key = jax.random.PRNGKey(0)
    kx, kp1, kp2, kp3 = jax.random.split(key, 4)

    n, hw = 2, 16
    x = jax.random.normal(kx, (n, 4, hw, hw), jnp.float32)

    # tile_h=4 at these small shapes to exercise multiple row-strips + halo logic.

    # Case 1: stride=1, in_planes != out_planes  -> fused conv+bn shortcut
    p1 = init_block_params(kp1, 4, 8, expansion=6, stride=1)
    prep1 = prepare_block_params(p1, stride=1)
    out1 = jax.block_until_ready(block_forward_pallas(x, prep1, tile_h=4))
    ref1 = block_forward_ref(x, p1, stride=1)
    assert out1.shape == (n, 8, hw, hw)
    assert jnp.allclose(out1, ref1, rtol=1e-4, atol=1e-4), (
        float(jnp.max(jnp.abs(out1 - ref1))))

    # Case 2: stride=2 -> no residual
    p2 = init_block_params(kp2, 4, 8, expansion=6, stride=2)
    prep2 = prepare_block_params(p2, stride=2)
    out2 = jax.block_until_ready(block_forward_pallas(x, prep2, tile_h=4))
    ref2 = block_forward_ref(x, p2, stride=2)
    assert out2.shape == (n, 8, hw // 2, hw // 2)
    assert jnp.allclose(out2, ref2, rtol=1e-4, atol=1e-4), (
        float(jnp.max(jnp.abs(out2 - ref2))))

    # Case 3: stride=1, in_planes == out_planes -> identity shortcut
    x3 = jax.random.normal(kx, (n, 8, hw, hw), jnp.float32)
    p3 = init_block_params(kp3, 8, 8, expansion=6, stride=1)
    prep3 = prepare_block_params(p3, stride=1)
    out3 = jax.block_until_ready(block_forward_pallas(x3, prep3, tile_h=4))
    ref3 = block_forward_ref(x3, p3, stride=1)
    assert out3.shape == (n, 8, hw, hw)
    assert jnp.allclose(out3, ref3, rtol=1e-4, atol=1e-4), (
        float(jnp.max(jnp.abs(out3 - ref3))))

    print("KERNEL_OK")
</pallas_src>

<mosaic_0001>
module attributes {stable_mosaic.version = 11 : i64} {
  func.func @_block_kernel(%arg0: i32, %arg1: i32, %arg2: memref<1x4x24x128xf32, #tpu.memory_space<vmem>>, %arg3: memref<1x4x24x128xf32, #tpu.memory_space<vmem>>, %arg4: memref<1x4x16x128xf32, #tpu.memory_space<vmem>>, %arg5: memref<128x128xf32, #tpu.memory_space<vmem>>, %arg6: memref<9x1x1x128xf32, #tpu.memory_space<vmem>>, %arg7: memref<1x1x128xf32, #tpu.memory_space<vmem>>, %arg8: memref<128x128xf32, #tpu.memory_space<vmem>>, %arg9: memref<128x128xf32, #tpu.memory_space<vmem>>, %arg10: memref<1x4x16x128xf32, #tpu.memory_space<vmem>>, %arg11: memref<6x24x128xf32, #tpu.memory_space<vmem>>) attributes {dimension_semantics = [#tpu.dimension_semantics<parallel>, #tpu.dimension_semantics<parallel>], iteration_bounds = array<i64: 2, 4>, scalar_prefetch = 0 : i64, scratch_operands = 1 : i64, tpu.core_type = #tpu.core_type<tc>, window_params = [{transform_indices = @transform_0, window_bounds = array<i64: 1, 4, 24, 128>}, {transform_indices = @transform_1, window_bounds = array<i64: 1, 4, 24, 128>}, {transform_indices = @transform_2, window_bounds = array<i64: 1, 4, 16, 128>}, {pipeline_mode = #tpu.pipeline_mode<synchronous>, transform_indices = @transform_3, window_bounds = array<i64: 128, 128>}, {pipeline_mode = #tpu.pipeline_mode<synchronous>, transform_indices = @transform_4, window_bounds = array<i64: 9, 1, 1, 128>}, {pipeline_mode = #tpu.pipeline_mode<synchronous>, transform_indices = @transform_5, window_bounds = array<i64: 1, 1, 128>}, {pipeline_mode = #tpu.pipeline_mode<synchronous>, transform_indices = @transform_6, window_bounds = array<i64: 128, 128>}, {pipeline_mode = #tpu.pipeline_mode<synchronous>, transform_indices = @transform_7, window_bounds = array<i64: 128, 128>}, {transform_indices = @transform_8, window_bounds = array<i64: 1, 4, 16, 128>}]} {
    %c0 = arith.constant 0 : index
    %c0_0 = arith.constant 0 : index
    %c0_1 = arith.constant 0 : index
    %c0_2 = arith.constant 0 : index
    %0 = vector.load %arg2[%c0, %c0_0, %c0_1, %c0_2] : memref<1x4x24x128xf32, #tpu.memory_space<vmem>>, vector<1x4x24x128xf32>
    %1 = vector.shape_cast %0 : vector<1x4x24x128xf32> to vector<4x24x128xf32>
    %2 = vector.shape_cast %1 : vector<4x24x128xf32> to vector<96x128xf32>
    %c0_3 = arith.constant 0 : index
    %c0_4 = arith.constant 0 : index
    %3 = vector.load %arg5[%c0_3, %c0_4] : memref<128x128xf32, #tpu.memory_space<vmem>>, vector<128x128xf32>
    %cst = arith.constant dense<0.000000e+00> : vector<96x128xf32>
    %4 = tpu.matmul %2, %3, %cst {dimension_numbers = #tpu.dot_dimension_numbers<[1], [0], [0], [1], [0, 0, 1, 1], [], []>} : vector<96x128xf32>, vector<128x128xf32>, vector<96x128xf32> -> vector<96x128xf32>
    %cst_5 = arith.constant 0.000000e+00 : f32
    %cst_6 = arith.constant 6.000000e+00 : f32
    %5 = vector.broadcast %cst_5 : f32 to vector<96x128xf32>
    %6 = arith.maximumf %5, %4 : vector<96x128xf32>
    %7 = vector.broadcast %cst_6 : f32 to vector<96x128xf32>
    %8 = arith.minimumf %7, %6 : vector<96x128xf32>
    %9 = vector.shape_cast %8 : vector<96x128xf32> to vector<4x24x128xf32>
    %c0_7 = arith.constant 0 : index
    %c0_8 = arith.constant 0 : index
    %c0_9 = arith.constant 0 : index
    %10 = vector.load %arg11[%c0_7, %c0_8, %c0_9] : memref<6x24x128xf32, #tpu.memory_space<vmem>>, vector<4x24x128xf32>
    tpu.vector_store %arg11[%c0_7, %c0_8, %c0_9], %9 {strides = array<i32>} : memref<6x24x128xf32, #tpu.memory_space<vmem>>, vector<4x24x128xf32>,
    %c0_10 = arith.constant 0 : index
    %c0_11 = arith.constant 0 : index
    %c0_12 = arith.constant 0 : index
    %c0_13 = arith.constant 0 : index
    %11 = vector.load %arg3[%c0_10, %c0_11, %c0_12, %c0_13] : memref<1x4x24x128xf32, #tpu.memory_space<vmem>>, vector<1x2x24x128xf32>
    %12 = vector.shape_cast %11 : vector<1x2x24x128xf32> to vector<2x24x128xf32>
    %13 = vector.shape_cast %12 : vector<2x24x128xf32> to vector<48x128xf32>
    %c0_14 = arith.constant 0 : index
    %c0_15 = arith.constant 0 : index
    %14 = vector.load %arg5[%c0_14, %c0_15] : memref<128x128xf32, #tpu.memory_space<vmem>>, vector<128x128xf32>
    %cst_16 = arith.constant dense<0.000000e+00> : vector<48x128xf32>
    %15 = tpu.matmul %13, %14, %cst_16 {dimension_numbers = #tpu.dot_dimension_numbers<[1], [0], [0], [1], [0, 0, 1, 1], [], []>} : vector<48x128xf32>, vector<128x128xf32>, vector<48x128xf32> -> vector<48x128xf32>
    %cst_17 = arith.constant 0.000000e+00 : f32
    %cst_18 = arith.constant 6.000000e+00 : f32
    %16 = vector.broadcast %cst_17 : f32 to vector<48x128xf32>
    %17 = arith.maximumf %16, %15 : vector<48x128xf32>
    %18 = vector.broadcast %cst_18 : f32 to vector<48x128xf32>
    %19 = arith.minimumf %18, %17 : vector<48x128xf32>
    %20 = vector.shape_cast %19 : vector<48x128xf32> to vector<2x24x128xf32>
    %c4 = arith.constant 4 : index
    %c0_19 = arith.constant 0 : index
    %c0_20 = arith.constant 0 : index
    %21 = vector.load %arg11[%c4, %c0_19, %c0_20] : memref<6x24x128xf32, #tpu.memory_space<vmem>>, vector<2x24x128xf32>
    tpu.vector_store %arg11[%c4, %c0_19, %c0_20], %20 {strides = array<i32>} : memref<6x24x128xf32, #tpu.memory_space<vmem>>, vector<2x24x128xf32>,
    %c0_21 = arith.constant 0 : index
    %c0_22 = arith.constant 0 : index
    %c0_23 = arith.constant 0 : index
    %22 = vector.load %arg11[%c0_21, %c0_22, %c0_23] : memref<6x24x128xf32, #tpu.memory_space<vmem>>, vector<4x16x128xf32>
    %c0_24 = arith.constant 0 : index
    %c0_25 = arith.constant 0 : index
    %c0_26 = arith.constant 0 : index
    %c0_27 = arith.constant 0 : index
    %23 = vector.load %arg6[%c0_24, %c0_25, %c0_26, %c0_27] : memref<9x1x1x128xf32, #tpu.memory_space<vmem>>, vector<1x1x1x128xf32>
    %24 = vector.shape_cast %23 : vector<1x1x1x128xf32> to vector<1x1x128xf32>
    %25 = vector.broadcast %24 : vector<1x1x128xf32> to vector<4x16x128xf32>
    %26 = arith.mulf %22, %25 : vector<4x16x128xf32>
    %c0_28 = arith.constant 0 : index
    %c1 = arith.constant 1 : index
    %c0_29 = arith.constant 0 : index
    %27 = vector.load %arg11[%c0_28, %c1, %c0_29] : memref<6x24x128xf32, #tpu.memory_space<vmem>>, vector<4x16x128xf32>
    %c1_30 = arith.constant 1 : index
    %c0_31 = arith.constant 0 : index
    %c0_32 = arith.constant 0 : index
    %c0_33 = arith.constant 0 : index
    %28 = vector.load %arg6[%c1_30, %c0_31, %c0_32, %c0_33] : memref<9x1x1x128xf32, #tpu.memory_space<vmem>>, vector<1x1x1x128xf32>
    %29 = vector.shape_cast %28 : vector<1x1x1x128xf32> to vector<1x1x128xf32>
    %30 = vector.broadcast %29 : vector<1x1x128xf32> to vector<4x16x128xf32>
    %31 = arith.mulf %27, %30 : vector<4x16x128xf32>
    %32 = arith.addf %26, %31 : vector<4x16x128xf32>
    %c0_34 = arith.constant 0 : index
    %c2 = arith.constant 2 : index
    %c0_35 = arith.constant 0 : index
    %33 = vector.load %arg11[%c0_34, %c2, %c0_35] : memref<6x24x128xf32, #tpu.memory_space<vmem>>, vector<4x16x128xf32>
    %c2_36 = arith.constant 2 : index
    %c0_37 = arith.constant 0 : index
    %c0_38 = arith.constant 0 : index
    %c0_39 = arith.constant 0 : index
    %34 = vector.load %arg6[%c2_36, %c0_37, %c0_38, %c0_39] : memref<9x1x1x128xf32, #tpu.memory_space<vmem>>, vector<1x1x1x128xf32>
    %35 = vector.shape_cast %34 : vector<1x1x1x128xf32> to vector<1x1x128xf32>
    %36 = vector.broadcast %35 : vector<1x1x128xf32> to vector<4x16x128xf32>
    %37 = arith.mulf %33, %36 : vector<4x16x128xf32>
    %38 = arith.addf %32, %37 : vector<4x16x128xf32>
    %c1_40 = arith.constant 1 : index
    %c0_41 = arith.constant 0 : index
    %c0_42 = arith.constant 0 : index
    %39 = vector.load %arg11[%c1_40, %c0_41, %c0_42] : memref<6x24x128xf32, #tpu.memory_space<vmem>>, vector<4x16x128xf32>
    %c3 = arith.constant 3 : index
    %c0_43 = arith.constant 0 : index
    %c0_44 = arith.constant 0 : index
    %c0_45 = arith.constant 0 : index
    %40 = vector.load %arg6[%c3, %c0_43, %c0_44, %c0_45] : memref<9x1x1x128xf32, #tpu.memory_space<vmem>>, vector<1x1x1x128xf32>
    %41 = vector.shape_cast %40 : vector<1x1x1x128xf32> to vector<1x1x128xf32>
    %42 = vector.broadcast %41 : vector<1x1x128xf32> to vector<4x16x128xf32>
    %43 = arith.mulf %39, %42 : vector<4x16x128xf32>
    %44 = arith.addf %38, %43 : vector<4x16x128xf32>
    %c1_46 = arith.constant 1 : index
    %c1_47 = arith.constant 1 : index
    %c0_48 = arith.constant 0 : index
    %45 = vector.load %arg11[%c1_46, %c1_47, %c0_48] : memref<6x24x128xf32, #tpu.memory_space<vmem>>, vector<4x16x128xf32>
    %c4_49 = arith.constant 4 : index
    %c0_50 = arith.constant 0 : index
    %c0_51 = arith.constant 0 : index
    %c0_52 = arith.constant 0 : index
    %46 = vector.load %arg6[%c4_49, %c0_50, %c0_51, %c0_52] : memref<9x1x1x128xf32, #tpu.memory_space<vmem>>, vector<1x1x1x128xf32>
    %47 = vector.shape_cast %46 : vector<1x1x1x128xf32> to vector<1x1x128xf32>
    %48 = vector.broadcast %47 : vector<1x1x128xf32> to vector<4x16x128xf32>
    %49 = arith.mulf %45, %48 : vector<4x16x128xf32>
    %50 = arith.addf %44, %49 : vector<4x16x128xf32>
    %c1_53 = arith.constant 1 : index
    %c2_54 = arith.constant 2 : index
    %c0_55 = arith.constant 0 : index
    %51 = vector.load %arg11[%c1_53, %c2_54, %c0_55] : memref<6x24x128xf32, #tpu.memory_space<vmem>>, vector<4x16x128xf32>
    %c5 = arith.constant 5 : index
    %c0_56 = arith.constant 0 : index
    %c0_57 = arith.constant 0 : index
    %c0_58 = arith.constant 0 : index
    %52 = vector.load %arg6[%c5, %c0_56, %c0_57, %c0_58] : memref<9x1x1x128xf32, #tpu.memory_space<vmem>>, vector<1x1x1x128xf32>
    %53 = vector.shape_cast %52 : vector<1x1x1x128xf32> to vector<1x1x128xf32>
    %54 = vector.broadcast %53 : vector<1x1x128xf32> to vector<4x16x128xf32>
    %55 = arith.mulf %51, %54 : vector<4x16x128xf32>
    %56 = arith.addf %50, %55 : vector<4x16x128xf32>
    %c2_59 = arith.constant 2 : index
    %c0_60 = arith.constant 0 : index
    %c0_61 = arith.constant 0 : index
    %57 = vector.load %arg11[%c2_59, %c0_60, %c0_61] : memref<6x24x128xf32, #tpu.memory_space<vmem>>, vector<4x16x128xf32>
    %c6 = arith.constant 6 : index
    %c0_62 = arith.constant 0 : index
    %c0_63 = arith.constant 0 : index
    %c0_64 = arith.constant 0 : index
    %58 = vector.load %arg6[%c6, %c0_62, %c0_63, %c0_64] : memref<9x1x1x128xf32, #tpu.memory_space<vmem>>, vector<1x1x1x128xf32>
    %59 = vector.shape_cast %58 : vector<1x1x1x128xf32> to vector<1x1x128xf32>
    %60 = vector.broadcast %59 : vector<1x1x128xf32> to vector<4x16x128xf32>
    %61 = arith.mulf %57, %60 : vector<4x16x128xf32>
    %62 = arith.addf %56, %61 : vector<4x16x128xf32>
    %c2_65 = arith.constant 2 : index
    %c1_66 = arith.constant 1 : index
    %c0_67 = arith.constant 0 : index
    %63 = vector.load %arg11[%c2_65, %c1_66, %c0_67] : memref<6x24x128xf32, #tpu.memory_space<vmem>>, vector<4x16x128xf32>
    %c7 = arith.constant 7 : index
    %c0_68 = arith.constant 0 : index
    %c0_69 = arith.constant 0 : index
    %c0_70 = arith.constant 0 : index
    %64 = vector.load %arg6[%c7, %c0_68, %c0_69, %c0_70] : memref<9x1x1x128xf32, #tpu.memory_space<vmem>>, vector<1x1x1x128xf32>
    %65 = vector.shape_cast %64 : vector<1x1x1x128xf32> to vector<1x1x128xf32>
    %66 = vector.broadcast %65 : vector<1x1x128xf32> to vector<4x16x128xf32>
    %67 = arith.mulf %63, %66 : vector<4x16x128xf32>
    %68 = arith.addf %62, %67 : vector<4x16x128xf32>
    %c2_71 = arith.constant 2 : index
    %c2_72 = arith.constant 2 : index
    %c0_73 = arith.constant 0 : index
    %69 = vector.load %arg11[%c2_71, %c2_72, %c0_73] : memref<6x24x128xf32, #tpu.memory_space<vmem>>, vector<4x16x128xf32>
    %c8 = arith.constant 8 : index
    %c0_74 = arith.constant 0 : index
    %c0_75 = arith.constant 0 : index
    %c0_76 = arith.constant 0 : index
    %70 = vector.load %arg6[%c8, %c0_74, %c0_75, %c0_76] : memref<9x1x1x128xf32, #tpu.memory_space<vmem>>, vector<1x1x1x128xf32>
    %71 = vector.shape_cast %70 : vector<1x1x1x128xf32> to vector<1x1x128xf32>
    %72 = vector.broadcast %71 : vector<1x1x128xf32> to vector<4x16x128xf32>
    %73 = arith.mulf %69, %72 : vector<4x16x128xf32>
    %74 = arith.addf %68, %73 : vector<4x16x128xf32>
    %c0_77 = arith.constant 0 : index
    %c0_78 = arith.constant 0 : index
    %c0_79 = arith.constant 0 : index
    %75 = vector.load %arg7[%c0_77, %c0_78, %c0_79] : memref<1x1x128xf32, #tpu.memory_space<vmem>>, vector<1x1x128xf32>
    %76 = vector.broadcast %75 : vector<1x1x128xf32> to vector<4x16x128xf32>
    %77 = arith.addf %74, %76 : vector<4x16x128xf32>
    %cst_80 = arith.constant 0.000000e+00 : f32
    %cst_81 = arith.constant 6.000000e+00 : f32
    %78 = vector.broadcast %cst_80 : f32 to vector<4x16x128xf32>
    %79 = arith.maximumf %78, %77 : vector<4x16x128xf32>
    %80 = vector.broadcast %cst_81 : f32 to vector<4x16x128xf32>
    %81 = arith.minimumf %80, %79 : vector<4x16x128xf32>
    %82 = vector.shape_cast %81 : vector<4x16x128xf32> to vector<64x128xf32>
    %c0_82 = arith.constant 0 : index
    %c0_83 = arith.constant 0 : index
    %83 = vector.load %arg8[%c0_82, %c0_83] : memref<128x128xf32, #tpu.memory_space<vmem>>, vector<128x128xf32>
    %cst_84 = arith.constant dense<0.000000e+00> : vector<64x128xf32>
    %84 = tpu.matmul %82, %83, %cst_84 {dimension_numbers = #tpu.dot_dimension_numbers<[1], [0], [0], [1], [0, 0, 1, 1], [], []>} : vector<64x128xf32>, vector<128x128xf32>, vector<64x128xf32> -> vector<64x128xf32>
    %c0_85 = arith.constant 0 : index
    %c0_86 = arith.constant 0 : index
    %c0_87 = arith.constant 0 : index
    %c0_88 = arith.constant 0 : index
    %85 = vector.load %arg4[%c0_85, %c0_86, %c0_87, %c0_88] : memref<1x4x16x128xf32, #tpu.memory_space<vmem>>, vector<1x4x16x128xf32>
    %86 = vector.shape_cast %85 : vector<1x4x16x128xf32> to vector<4x16x128xf32>
    %87 = vector.shape_cast %86 : vector<4x16x128xf32> to vector<64x128xf32>
    %c0_89 = arith.constant 0 : index
    %c0_90 = arith.constant 0 : index
    %88 = vector.load %arg9[%c0_89, %c0_90] : memref<128x128xf32, #tpu.memory_space<vmem>>, vector<128x128xf32>
    %cst_91 = arith.constant dense<0.000000e+00> : vector<64x128xf32>
    %89 = tpu.matmul %87, %88, %cst_91 {dimension_numbers = #tpu.dot_dimension_numbers<[1], [0], [0], [1], [0, 0, 1, 1], [], []>} : vector<64x128xf32>, vector<128x128xf32>, vector<64x128xf32> -> vector<64x128xf32>
    %90 = arith.addf %84, %89 : vector<64x128xf32>
    %91 = vector.shape_cast %90 : vector<64x128xf32> to vector<1x4x16x128xf32>
    %c0_92 = arith.constant 0 : index
    %c0_93 = arith.constant 0 : index
    %c0_94 = arith.constant 0 : index
    %c0_95 = arith.constant 0 : index
    %92 = vector.load %arg10[%c0_92, %c0_93, %c0_94, %c0_95] : memref<1x4x16x128xf32, #tpu.memory_space<vmem>>, vector<1x4x16x128xf32>
    tpu.vector_store %arg10[%c0_92, %c0_93, %c0_94, %c0_95], %91 {strides = array<i32>} : memref<1x4x16x128xf32, #tpu.memory_space<vmem>>, vector<1x4x16x128xf32>,
    return
  }
  func.func @transform_0(%arg0: i32, %arg1: i32) -> (i32, i32, i32, i32) {
    %c0_i32 = arith.constant 0 : i32
    %c0_i32_0 = arith.constant 0 : i32
    %c0_i32_1 = arith.constant 0 : i32
    return %arg0, %arg1, %c0_i32, %c0_i32_0 : i32, i32, i32, i32
  }
  func.func @transform_1(%arg0: i32, %arg1: i32) -> (i32, i32, i32, i32) {
    %c1_i32 = arith.constant 1 : i32
    %0 = arith.addi %arg1, %c1_i32 : i32
    %c0_i32 = arith.constant 0 : i32
    %c0_i32_0 = arith.constant 0 : i32
    %c0_i32_1 = arith.constant 0 : i32
    return %arg0, %0, %c0_i32, %c0_i32_0 : i32, i32, i32, i32
  }
  func.func @transform_2(%arg0: i32, %arg1: i32) -> (i32, i32, i32, i32) {
    %c0_i32 = arith.constant 0 : i32
    %c0_i32_0 = arith.constant 0 : i32
    %c0_i32_1 = arith.constant 0 : i32
    return %arg0, %arg1, %c0_i32, %c0_i32_0 : i32, i32, i32, i32
  }
  func.func @transform_3(%arg0: i32, %arg1: i32) -> (i32, i32) {
    %c0_i32 = arith.constant 0 : i32
    %c0_i32_0 = arith.constant 0 : i32
    %c0_i32_1 = arith.constant 0 : i32
    return %c0_i32, %c0_i32_0 : i32, i32
  }
  func.func @transform_4(%arg0: i32, %arg1: i32) -> (i32, i32, i32, i32) {
    %c0_i32 = arith.constant 0 : i32
    %c0_i32_0 = arith.constant 0 : i32
    %c0_i32_1 = arith.constant 0 : i32
    %c0_i32_2 = arith.constant 0 : i32
    %c0_i32_3 = arith.constant 0 : i32
    return %c0_i32, %c0_i32_0, %c0_i32_1, %c0_i32_2 : i32, i32, i32, i32
  }
  func.func @transform_5(%arg0: i32, %arg1: i32) -> (i32, i32, i32) {
    %c0_i32 = arith.constant 0 : i32
    %c0_i32_0 = arith.constant 0 : i32
    %c0_i32_1 = arith.constant 0 : i32
    %c0_i32_2 = arith.constant 0 : i32
    return %c0_i32, %c0_i32_0, %c0_i32_1 : i32, i32, i32
  }
  func.func @transform_6(%arg0: i32, %arg1: i32) -> (i32, i32) {
    %c0_i32 = arith.constant 0 : i32
    %c0_i32_0 = arith.constant 0 : i32
    %c0_i32_1 = arith.constant 0 : i32
    return %c0_i32, %c0_i32_0 : i32, i32
  }
  func.func @transform_7(%arg0: i32, %arg1: i32) -> (i32, i32) {
    %c0_i32 = arith.constant 0 : i32
    %c0_i32_0 = arith.constant 0 : i32
    %c0_i32_1 = arith.constant 0 : i32
    return %c0_i32, %c0_i32_0 : i32, i32
  }
  func.func @transform_8(%arg0: i32, %arg1: i32) -> (i32, i32, i32, i32) {
    %c0_i32 = arith.constant 0 : i32
    %c0_i32_0 = arith.constant 0 : i32
    %c0_i32_1 = arith.constant 0 : i32
    return %arg0, %arg1, %c0_i32, %c0_i32_0 : i32, i32, i32, i32
  }
}

</mosaic_0001>

<bundles_post_ra>
// kernel: tpu_custom_call.1
= control target key start
LH: loop header
LB: loop body
LE: loop exit
PB: predicated region body
PF: predicated region fallthrough
CT: control target
= control target key end

     0   :  { %s2453_s0 = inlined_call_operand.hbm [shape: f32[2,20,24,128], index: 0, kind: input, shape index: {}]   ;;  %s2454_s1 = inlined_call_operand.hbm [shape: f32[2,20,24,128], index: 1, kind: input, shape index: {}]   ;;  %s2455_s2 = inlined_call_operand.hbm [shape: f32[2,16,16,128], index: 2, kind: input, shape index: {}]   ;;  %s2456_s3 = inlined_call_operand.hbm [shape: f32[128,128], index: 3, kind: input, shape index: {}]   ;;  %s2457_s4 = inlined_call_operand.hbm [shape: f32[9,1,1,128], index: 4, kind: input, shape index: {}]   ;;  %s2458_s5 = inlined_call_operand.vmem [shape: f32[1,1,128], index: 5, kind: input, shape index: {}]   ;;  %s2459_s6 = inlined_call_operand.hbm [shape: f32[128,128], index: 6, kind: input, shape index: {}]   ;;  %s2460_s7 = inlined_call_operand.hbm [shape: f32[128,128], index: 7, kind: input, shape index: {}]   ;;  %s2461_s8 = inlined_call_operand.hbm [shape: f32[2,16,16,128], index: 8, kind: output, shape index: {}]  }
   0x1   :  { %2474 = sst [smem:[#allocation31_spill]] %s2453_s0 }
   0x2   :  { %2475 = sst [smem:[#allocation32_spill]] %s2454_s1 }
   0x3   :  { %2476 = sst [smem:[#allocation33_spill]] %s2456_s3 }
   0x4   :  { %2477 = sst [smem:[#allocation34_spill]] %s2457_s4 }
   0x5   :  { %2478 = sst [smem:[#allocation35_spill]] %s2458_s5 }
   0x6   :  { %2479 = sst [smem:[#allocation36_spill]] %s2459_s6 }
   0x7   :  { %2480 = sst [smem:[#allocation37_spill]] %s2460_s7 }
   0x8   :  { %2481 = sst [smem:[#allocation38_spill]] %s2461_s8 }
   0x9   :  { %13 = vsyncpa [#allocation4], 0 }
   0xa   :  { %15 = vsyncpa [#allocation4 + $0x1], 0 }
   0xb   :  { %16 = vsyncpa [#allocation7], 0 }
   0xc   :  { %18 = vsyncpa [#allocation7 + $0x1], 0 }
   0xd   :  { %19 = vsyncpa [#allocation10], 0 }
   0xe   :  { %20 = vsyncpa [#allocation13], 0 }
   0xf   :  { %21 = vsyncpa [#allocation5], 0 }
  0x10   :  { %23 = vsyncpa [#allocation5 + $0x1], 0  ;;  %s1925_s27 = smov 0   ;;  %s1927_s28 = smov 0  }
  0x11   :  { %s1929_s29 = smov 0   ;;  %s1931_s30 = smov 0  }
  0x12   :  { %s1933_s9 = smov 0   ;;  %s1935_s10 = smov 0  }
  0x13   :  { %s1937_s11 = smov 0   ;;  %s1939_s12 = smov 0  }
  0x14   :  { %s1941_s13 = smov 0   ;;  %s1943_s14 = smov 0  }
  0x15   :  { %s1945_s15 = smov 0  }
  0x16 LB: > { %2482 = sst [smem:[#allocation22_spill]] %s1832_s28  ;;  %s1981_s16 = sadd.s32 4294967295, %s1868_s15   ;;  %s1868_s15 = sphi %s1945_s15, %s29_s15   ;;  %s1864_s14 = sphi %s1943_s14, %s2525_s14   ;;  %s1860_s13 = sphi %s1941_s13, %s2524_s13   ;;  %s1856_s12 = sphi %s1939_s12, %s2523_s12   ;;  %s1852_s11 = sphi %s1937_s11, %s2522_s11   ;;  %s1848_s10 = sphi %s1935_s10, %s2521_s10   ;;  %s1844_s9 = sphi %s1933_s9, %s2520_s9   ;;  %s1840_s30 = sphi %s1931_s30, %s2519_s30   ;;  %s1836_s29 = sphi %s1929_s29, %s2516_s29   ;;  %s1832_s28 = sphi %s1927_s28, %s2515_s28   ;;  %s1828_s27 = sphi %s1925_s27, %s2514_s27  }
  0x17   : > { %2483 = sst [smem:[#allocation23_spill]] %s1836_s29  ;;  %p1314_p0 = scmp.ge.s32.totalorder %s1868_s15, 1 }
  0x18   : > { %2484 = sst [smem:[#allocation24_spill]] %s1852_s11  ;;  %p64_p1 = scmp.eq.s32.totalorder %s1981_s16, 0 }
  0x19   : > { %2485 = sst [smem:[#allocation25_spill]] %s1856_s12  ;;  %p252_p2 = scmp.eq.s32.totalorder %s1981_s16, 7 }
  0x1a   : > { %p265_p3 = scmp.lt.s32.totalorder %s1868_s15, 9  ;;  %s2486_s3 = sld [smem:[#allocation33_spill]] }
  0x1b   : > { %s1870_s21 = smov [#allocation9]   ;;  %s2490_s6 = sld [smem:[#allocation36_spill]] }
  0x1c   : > { %p1990_p4 = pnand %p1314_p0, %p265_p3  ;;  %s278_s22 = sshll.u32 %s1870_s21, 4  ;;  %s279_s22 = int_to_ptr.vmem [resolvable:$true] %s278_s22 }
  0x1d   : > { %s1871_s17 = smov [#allocation12]   ;;  %s2462_s21 = smov 128  }
  0x1e   : > { %s2487_s20 = scalar_select %p1990_p4, 1, 0 }
  0x1f   : > { %p1375_p5 = pneg %p1990_p4  ;;  %s309_s18 = sshll.u32 %s1871_s17, 4  ;;  %s310_s18 = int_to_ptr.vmem [resolvable:$true] %s309_s18 }
  0x20   : > { %s276_s19 = sshll.u32 %s2486_s3, 4  ;;  %2488 = sst [smem:[#allocation26_spill]] %s2487_s20  ;;  %s277_s19 = int_to_ptr.hbm [resolvable:$true] %s276_s19 }
  0x21   : > { %p1998_p6 = pnand %p1375_p5, %p64_p1  ;;  %s307_s26 = sshll.u32 %s2490_s6, 4  ;;  %s308_s26 = int_to_ptr.hbm [resolvable:$true] %s307_s26 }
  0x22   : > { %s2464_s3 = smov 8   ;;  %s38_s24 = sadd.s32 1, %s1860_s13 }
  0x23   : > { %1378 = dma.hbm_to_vmem [thread:$0]  (!%p1998_p6), %s277_s19, 2048, %s279_s22, [#allocation10], %s2462_s21, %s2462_s21, %s2464_s3  }
  0x24   : > { %1384 = dma.hbm_to_vmem [thread:$0]  (!%p1998_p6), %s308_s26, 2048, %s310_s18, [#allocation13], %s2462_s21, %s2462_s21, %s2464_s3  }
  0x25   : > { %p39_p7 = scmp.ge.s32.totalorder %s38_s24, 4  ;;  %s41_s25 = sadd.s32 1, %s1864_s14 }
  0x26   : > { %p58_p8 = scmp.eq.s32.totalorder %s1868_s15, 0  ;;  %s80_s17 = sadd.s32 1, %s1836_s29 }
  0x27   : > { %s2019_s6 = scalar_select %p39_p7, 0, %s38_s24  }
  0x28   : > { %s2527_s25 = smov (!%p39_p7, %s41_s25), %s1864_s14  ;;  %p87_p10 = scmp.ne.s32.totalorder %s1836_s29, %s1832_s28 }
  0x29   : > { %2491 = sst [smem:[#allocation27_spill]] %s2019_s6  ;;  %s46_s19 = ssub.s32 %s1860_s13, %s2019_s6 }
  0x2a   : > { %s74_s22 = sadd.s32 1, %s2019_s6  ;;  %p43_p9 = scmp.ge.s32.totalorder %s2527_s25, 2 }
  0x2b   : > { %s76_s26 = ssub.s32 %s38_s24, %s74_s22  ;;  %p93_p11 = scmp.ne.s32.totalorder %s1832_s28, %s1828_s27 }
  0x2c   : > { %s2529_s25 = smov (%p43_p9, %s2527_s25), 0  ;;  %p2033_p12 = por %p87_p10, %p58_p8 }
  0x2d   : > { %2492 = sst [smem:[#allocation28_spill]] %s2529_s25  ;;  %p2039_p13 = por %p93_p11, %p64_p1 }
  0x2e   : > { %s45_s3 = ssub.s32 %s1864_s14, %s2529_s25  ;;  %p1406_p0 = scmp.lt.s32.totalorder %s1868_s15, 8 }
  0x2f   : > { %s2494_s21 = scalar_select %p2039_p13, 1, 0 }
  0x30   : > { %s2046_s24 = sor.u32 %s46_s19, %s45_s3  ;;  %s77_s27 = sor.u32 %s76_s26, %s45_s3 }
  0x31   : > { %2495 = sst [smem:[#allocation29_spill]] %s2494_s21  ;;  %p48_p3 = scmp.eq.s32.totalorder %s2046_s24, 0 }
  0x32   : > { %p78_p5 = scmp.eq.s32.totalorder %s77_s27, 0  ;;  %s1346_s22 = smul.u32 12, %s1860_s13 }
  0x33   : > { %s362_s6 = sand.u32 1, %s1868_s15   ;;  %s1347_s12 = smul.u32 60, %s1864_s14 }
  0x34   : > { %s2052_s8 = scalar_select %p78_p5, %s1836_s29, %s80_s17  }
  0x35   : > { %s364_s11 = sand.u32 1, %s1836_s29   ;;  %p1392_p7 = pnand %p1406_p0, %p2033_p12 }
  0x36   : > { %2496 = sst [smem:[#allocation30_spill]] %s2052_s8  ;;  %s2060_s5 = sadd.s32 %s1347_s12, %s1346_s22 }
  0x37   : > { %s1348_s25 = smul.u32 96, %s364_s11  ;;  %s1322_s19 = sshll.u32 %s2060_s5, 3 }
  0x38   : > { %s2497_s1 = sld [smem:[#allocation32_spill]]  ;;  %s2071_s11 = scalar_lea.sflag [#allocation7], %s362_s6 }
  0x39   : > { %s366_s17 = scalar_lea.vmem [#allocation6], %s1348_s25  ;;  %s2498_s4 = sld [smem:[#allocation34_spill]] }
  0x3a   : > { %s378_s8 = sshll.u32 %s366_s17, 4  ;;  %s2499_s22 = smov 8   ;;  %s379_s8 = int_to_ptr.vmem [resolvable:$true] %s378_s8 }
  0x3b   : > { %s2500_s20 = smov 128   ;;  %s1874_s21 = smov [#allocation11]  }
  0x3c   : > { %s292_s25 = sshll.u32 %s1874_s21, 4  ;;  %s1875_s6 = smov 16   ;;  %s293_s25 = int_to_ptr.vmem [resolvable:$true] %s292_s25 }
  0x3d   : > { %s1876_s29 = smov 1   ;;  %s2501_s7 = sld [smem:[#allocation37_spill]] }
  0x3e   : > { %s1181_s26 = scalar_lea.hbm %s2497_s1, %s1322_s19  ;;  %s1313_s17 = sadd.s32 4294967294, %s1868_s15  }
  0x3f   : > { %s1182_s27 = scalar_lea.hbm %s1181_s26, 96  ;;  %s290_s12 = sshll.u32 %s2498_s4, 4  ;;  %s291_s12 = int_to_ptr.hbm [resolvable:$true] %s290_s12 }
  0x40   : > { %s376_s28 = sshll.u32 %s1182_s27, 4  ;;  %s50_s18 = sadd.s32 1, %s1848_s10  ;;  %s377_s28 = int_to_ptr.hbm [resolvable:$true] %s376_s28 }
  0x41   : > { %1394 = dma.hbm_to_vmem [thread:$0]  (!%p1392_p7), %s377_s28, 1536, %s379_s8, %s2071_s11, %s2500_s20, %s2500_s20, %s2499_s22  }
  0x42   : > { %1381 = dma.hbm_to_vmem [thread:$0]  (!%p1998_p6), %s291_s12, 144, %s293_s25, [#allocation10], %s1875_s6, %s1875_s6, %s1876_s29  }
  0x43   : > { %s321_s8 = sshll.u32 %s2501_s7, 4  ;;  %s1877_s28 = smov [#allocation14]   ;;  %s322_s8 = int_to_ptr.hbm [resolvable:$true] %s321_s8 }
  0x44   : > { %s323_s27 = sshll.u32 %s1877_s28, 4  ;;  %p57_p9 = scmp.ne.s32.totalorder %s1848_s10, %s1844_s9  ;;  %s324_s27 = int_to_ptr.vmem [resolvable:$true] %s323_s27 }
  0x45   : > { %1387 = dma.hbm_to_vmem [thread:$0]  (!%p1998_p6), %s322_s8, 2048, %s324_s27, [#allocation13], %s2500_s20, %s2500_s20, %s2499_s22  }
  0x46   : > { %s2094_s12 = scalar_select %p48_p3, %s1848_s10, %s50_s18  }
  0x47   : > { %p59_p10 = por %p58_p8, %p57_p9  ;;  %p63_p11 = scmp.ne.s32.totalorder %s1844_s9, %s1840_s30 }
  0x48   : > { %p2102_p12 = por %p252_p2, %p57_p9  ;;  %p258_p5 = scmp.eq.s32.totalorder %s1313_s17, 7 }
  0x49   : > { %p2108_p7 = por %p64_p1, %p63_p11  ;;  %s337_s25 = sand.u32 1, %s1848_s10  }
  0x4a   : > { %p2113_p6 = por %p258_p5, %p63_p11  ;;  %s1345_s6 = smul.u32 96, %s337_s25 }
  0x4b   : > { %s2505_s0 = sld [smem:[#allocation31_spill]]  ;;  %p2124_p2 = pnand %p1406_p0, %p59_p10 }
  0x4c   : > { %s341_s27 = scalar_lea.vmem [#allocation3], %s1345_s6  ;;  %s1324_s18 = sshll.u32 %s337_s25, 6 }
  0x4d   : > { %s352_s17 = sshll.u32 %s341_s27, 4  ;;  %s338_s1 = scalar_lea.sflag [#allocation4], %s337_s25  ;;  %s353_s17 = int_to_ptr.vmem [resolvable:$true] %s352_s17 }
  0x4e   : > { %s1343_s5 = sshll.u32 %s1860_s13, 3  ;;  %s392_s29 = scalar_lea.vmem [#allocation8], %s1324_s18 }
  0x4f   : > { %s403_s3 = sshll.u32 %s392_s29, 4  ;;  %s404_s3 = int_to_ptr.vmem [resolvable:$true] %s403_s3 }
  0x51   : > { %s349_s26 = scalar_lea.hbm %s2505_s0, %s1322_s19  ;;  %s1327_s19 = sshll.u32 %s1864_s14, 5 }
  0x52   : > { %s350_s8 = sshll.u32 %s349_s26, 4  ;;  %s398_s26 = sadd.s32 %s1343_s5, %s1327_s19  ;;  %s351_s8 = int_to_ptr.hbm [resolvable:$true] %s350_s8 }
  0x53   : > { %1391 = dma.hbm_to_vmem [thread:$0]  (!%p2124_p2), %s351_s8, 1536, %s353_s17, %s338_s1, %s2500_s20, %s2500_s20, %s2499_s22  }
  0x54   : > { %s1328_s0 = sshll.u32 %s398_s26, 3  ;;  %415 = sbr.rel (%p1990_p4) target bundleno = 548 (0x224), region = 52 }
  0x55   : > { %s400_s6 = scalar_lea.hbm %s2455_s2, %s1328_s0  ;;  %s2147_s1 = sand.u32 (!%p1990_p4), 1, %s1844_s9  }
  0x56   : > { %s401_s27 = sshll.u32 %s400_s6, 4  ;;  %s1349_s8 = smul.u32 (!%p1990_p4), 96, %s2147_s1  ;;  %s402_s27 = int_to_ptr.hbm [resolvable:$true] %s401_s27 }
  0x57   : > { %1397 = dma.hbm_to_vmem [thread:$0]  (!%p2124_p2), %s402_s27, 1024, %s404_s3, %s2071_s11, %s2500_s20, %s2500_s20, %s2499_s22  }
  0x58   : > { %s418_s4 = scalar_lea.sflag (!%p1990_p4), [#allocation4], %s2147_s1  ;;  %s2151_s0 = scalar_lea.vmem (!%p1990_p4), [#allocation3], %s1349_s8 }
  0x59   : > { %1803 = dma.done.wait (%p2108_p7), %s418_s4, 1536  }
  0x5a   : > { %1805 = vsyncadd (%p2108_p7), %s418_s4, 4294965760  ;;  %s2508_s7 = sld [smem:[#allocation22_spill]]  ;;  %s427_s11 = sand.u32 1, %s1981_s16  }
  0x5b   : > { %s428_s17 = scalar_lea.sflag [#allocation7], %s427_s11 }
  0x60   : > { %s429_s22 = sand.u32 1, %s2508_s7  }
  0x61   : > { %s1350_s28 = smul.u32 96, %s429_s22 }
  0x63   : > { %s2159_s18 = scalar_lea.vmem [#allocation6], %s1350_s28 }
  0x64   : > { %1807 = dma.done.wait (%p2039_p13), %s428_s17, 1536  }
  0x65   : > { %1809 = vsyncadd (%p2039_p13), %s428_s17, 4294965760  ;;  %s1330_s5 = sshll.u32 %s2147_s1, 6 }
  0x66   : > { %s2168_s19 = scalar_lea.vmem [#allocation8], %s1330_s5 }
  0x67   : > { %1811 = dma.done.wait (%p2108_p7), %s428_s17, 1024  }
  0x68   : > { %1813 = vsyncadd (%p2108_p7), %s428_s17, 4294966272 }
  0x69   : > { %1815 = dma.done.wait (%p64_p1), [#allocation10], 2192  }
  0x6a   : > { %1817 = vsyncadd (%p64_p1), [#allocation10], 4294965104 }
  0x6b   : > { %1819 = dma.done.wait (%p64_p1), [#allocation13], 4096  }
  0x6c   : > { %1821 = vsyncadd (%p64_p1), [#allocation13], 4294963200  ;;  %v537_v0 = vld [vmem:[#allocation9 + $0x78] sm:$0xff]  ;;  %v536_v1 = vld [vmem:[#allocation9 + $0x70] sm:$0xff]  ;;  %s2510_s29 = sld [smem:[#allocation35_spill]]  ;;  %s2389_s3 = scalar_lea.vmem [#allocation15], %s1330_s5 }
  0x6d   : > { %538 = vmatpush.msra.mxu0 %v537_v0  ;;  %649 = vmatpush.msra.mxu1 %v537_v0  ;;  %v535_v2 = vld [vmem:[#allocation9 + $0x68] sm:$0xff]  ;;  %v534_v3 = vld [vmem:[#allocation9 + $0x60] sm:$0xff]  ;;  %v533_v4 = vld [vmem:[#allocation9 + $0x58] sm:$0xff]  ;;  %s2511_s26 = sld [smem:[#allocation24_spill]]  ;;  %s1131_s22 = sshll.u32 %s2389_s3, 4  ;;  %s1132_s22 = int_to_ptr.vmem [resolvable:$true] %s1131_s22 }
  0x6e   : > { %v532_v5 = vld [vmem:[#allocation9 + $0x50] sm:$0xff]  ;;  %v531_v6 = vld [vmem:[#allocation9 + $0x48] sm:$0xff]  ;;  %v530_v7 = vld [vmem:[#allocation9 + $0x40] sm:$0xff]  ;;  %s2512_s6 = sld [smem:[#allocation25_spill]]  ;;  %s1116_s17 = scalar_lea.sflag [#allocation5], %s2147_s1 }
  0x6f   : > { %539 = vmatpush.msra.mxu0 %v536_v1  ;;  %650 = vmatpush.msra.mxu1 %v536_v1  ;;  %v529_v8 = vld [vmem:[#allocation9 + $0x38] sm:$0xff]  ;;  %v528_v9 = vld [vmem:[#allocation9 + $0x30] sm:$0xff]  ;;  %v527_v10 = vld [vmem:[#allocation9 + $0x28] sm:$0xff]  ;;  %s2513_s20 = sld [smem:[#allocation38_spill]] }
  0x70   : > { %v526_v11 = vld [vmem:[#allocation9 + $0x20] sm:$0xff]  ;;  %v525_v12 = vld [vmem:[#allocation9 + $0x18] sm:$0xff]  ;;  %v524_v13 = vld [vmem:[#allocation9 + $0x10] sm:$0xff] }
  0x71   : > { %540 = vmatpush.msra.mxu0 %v535_v2  ;;  %651 = vmatpush.msra.mxu1 %v535_v2  ;;  %v523_v14 = vld [vmem:[#allocation9 + $0x8] sm:$0xff]  ;;  %v522_v15 = vld [vmem:[#allocation9] sm:$0xff]  ;;  %v512_v18 = vld [vmem:[%s2151_s0 + $0x10] sm:$0xff] }
  0x72   : > { %v510_v16 = vld [vmem:[%s2151_s0] sm:$0xff]  ;;  %v511_v17 = vld [vmem:[%s2151_s0 + $0x8] sm:$0xff]  ;;  %v513_v19 = vld [vmem:[%s2151_s0 + $0x18] sm:$0xff] }
  0x73   : > { %541 = vmatpush.msra.mxu0 %v534_v3  ;;  %652 = vmatpush.msra.mxu1 %v534_v3  ;;  %v627_v20 = vld [vmem:[%s2159_s18] sm:$0xff]  ;;  %v628_v22 = vld [vmem:[%s2159_s18 + $0x8] sm:$0xff]  ;;  %v629_v24 = vld [vmem:[%s2159_s18 + $0x10] sm:$0xff]  ;;  %s1344_s27 = sshll.u32 %s2511_s26, 3 }
  0x74   : > { %v514_v21 = vld [vmem:[%s2151_s0 + $0x20] sm:$0xff]  ;;  %v515_v23 = vld [vmem:[%s2151_s0 + $0x28] sm:$0xff]  ;;  %v516_v25 = vld [vmem:[%s2151_s0 + $0x30] sm:$0xff]  ;;  %s1339_s25 = sshll.u32 %s2512_s6, 5 }
  0x75   : > { %542 = vmatpush.msra.mxu0 %v533_v4  ;;  %653 = vmatpush.msra.mxu1 %v533_v4  ;;  %v630_v26 = vld [vmem:[%s2159_s18 + $0x18] sm:$0xff]  ;;  %v631_v28 = vld [vmem:[%s2159_s18 + $0x20] sm:$0xff]  ;;  %v632_v30 = vld [vmem:[%s2159_s18 + $0x28] sm:$0xff]  ;;  %s1128_s8 = sadd.s32 %s1344_s27, %s1339_s25  ;;  %s1750_s23 = scalar_lea.hbm %s2513_s20, 512 }
  0x76   : > { %v517_v27 = vld [vmem:[%s2151_s0 + $0x38] sm:$0xff]  ;;  %v518_v29 = vld [vmem:[%s2151_s0 + $0x40] sm:$0xff]  ;;  %v519_v31 = vld [vmem:[%s2151_s0 + $0x48] sm:$0xff]  ;;  %s1340_s4 = sshll.u32 %s1128_s8, 3 }
  0x77   : > { %543 = vmatpush.msra.mxu0 %v532_v5  ;;  %654 = vmatpush.msra.mxu1 %v532_v5  ;;  %v520_v32 = vld [vmem:[%s2151_s0 + $0x50] sm:$0xff]  ;;  %v521_v33 = vld [vmem:[%s2151_s0 + $0x58] sm:$0xff]  ;;  %v1024_v42 = vld [vmem:[#allocation14 + $0x78] sm:$0xff]  ;;  %s1130_s11 = scalar_lea.hbm %s2513_s20, %s1340_s4 }
  0x78   : > { %v1000_v43 = vld [vmem:[#allocation12 + $0x78] sm:$0xff]  ;;  %1025 = vmatpush.msra.mxu2 %v1024_v42  ;;  %v1023_v45 = vld [vmem:[#allocation14 + $0x70] sm:$0xff]  ;;  %v1022_v47 = vld [vmem:[#allocation14 + $0x68] sm:$0xff]  ;;  %s1133_s28 = sshll.u32 %s1130_s11, 4  ;;  %s1134_s28 = int_to_ptr.hbm [resolvable:$true] %s1133_s28 }
  0x79   : > { %544 = vmatpush.msra.mxu0 %v531_v6  ;;  %655 = vmatpush.msra.mxu1 %v531_v6  ;;  %v999_v46 = vld [vmem:[#allocation12 + $0x70] sm:$0xff]  ;;  %v998_v48 = vld [vmem:[#allocation12 + $0x68] sm:$0xff]  ;;  %v1021_v49 = vld [vmem:[#allocation14 + $0x60] sm:$0xff]  ;;  %s1744_s18 = sshra.s32 %s1134_s28, 4  ;;  %s1745_s18 = int_to_ptr.hbm [resolvable:$true] %s1744_s18 }
  0x7a   : > { %1066 = vmatpush.msra.mxu3 %v1000_v43  ;;  %1026 = vmatpush.msra.mxu2 %v1023_v45  ;;  %v997_v50 = vld [vmem:[#allocation12 + $0x60] sm:$0xff]  ;;  %v1020_v53 = vld [vmem:[#allocation14 + $0x58] sm:$0xff]  ;;  %v1019_v56 = vld [vmem:[#allocation14 + $0x50] sm:$0xff]  ;;  %s1746_s5 = scalar_lea.hbm %s1745_s18, 64  ;;  %p1751_p13 = scmp.lt.s32.totalorder %s1745_s18, %s2513_s20 }
  0x7b   : > { %545 = vmatpush.msra.mxu0 %v530_v7  ;;  %656 = vmatpush.msra.mxu1 %v530_v7  ;;  %v996_v54 = vld [vmem:[#allocation12 + $0x58] sm:$0xff]  ;;  %v995_v57 = vld [vmem:[#allocation12 + $0x50] sm:$0xff]  ;;  %v1018_v60 = vld [vmem:[#allocation14 + $0x48] sm:$0xff]  ;;  %p1747_p1 = scmp.ne.s32.totalorder %s1745_s18, %s1746_s5  ;;  %p1752_p0 = scmp.lt.s32.totalorder %s1750_s23, %s1746_s5 }
  0x7c   : > { %1067 = vmatpush.msra.mxu3 %v999_v46  ;;  %1027 = vmatpush.msra.mxu2 %v1022_v47  ;;  %v994_v61 = vld [vmem:[#allocation12 + $0x48] sm:$0xff]  ;;  %v1017_v63 = vld [vmem:[#allocation14 + $0x40] sm:$0xff]  ;;  %v1016_v3 = vld [vmem:[#allocation14 + $0x38] sm:$0xff] }
  0x7d   : > { %546 = vmatpush.msra.mxu0 %v529_v8  ;;  %657 = vmatpush.msra.mxu1 %v529_v8  ;;  %v993_v0 = vld [vmem:[#allocation12 + $0x40] sm:$0xff]  ;;  %v992_v4 = vld [vmem:[#allocation12 + $0x38] sm:$0xff]  ;;  %v1015_v6 = vld [vmem:[#allocation14 + $0x30] sm:$0xff]  ;;  %p1748_p4 = pnand %p1747_p1, %p2102_p12  ;;  %p1753_p3 = por %p1752_p0, %p1751_p13 }
  0x7e   : > { %1068 = vmatpush.msra.mxu3 %v998_v48  ;;  %1028 = vmatpush.msra.mxu2 %v1021_v49  ;;  %v991_v7 = vld [vmem:[#allocation12 + $0x30] sm:$0xff]  ;;  %v2231_v42 = vld [vmem:[#allocation11 + $0x3] ss:$0 sm:$0xff]  ;;  %v2233_v46 = vld [vmem:[#allocation11 + $0x4] ss:$0 sm:$0xff] }
  0x7f   : > { %547 = vmatpush.msra.mxu0 %v528_v9  ;;  %658 = vmatpush.msra.mxu1 %v528_v9  ;;  %p1749_p8 = pneg %p1748_p4 }
  0x80   : > { %1069 = vmatpush.msra.mxu3 %v997_v50  ;;  %1029 = vmatpush.msra.mxu2 %v1020_v53  ;;  %v1002_v50 = vld [vmem:[%s2168_s19 + $0x8] sm:$0xff] }
  0x81   : > { %548 = vmatpush.msra.mxu0 %v527_v10  ;;  %659 = vmatpush.msra.mxu1 %v527_v10  ;;  %v1014_v10 = vld [vmem:[#allocation14 + $0x28] sm:$0xff]  ;;  %p1754_p9 = pnand %p1753_p3, %p1749_p8 }
  0x82   : > { %1070 = vmatpush.msra.mxu3 %v996_v54  ;;  %1030 = vmatpush.msra.mxu2 %v1019_v56 }
  0x83   : > { %549 = vmatpush.msra.mxu0 %v526_v11  ;;  %660 = vmatpush.msra.mxu1 %v526_v11  ;;  %v990_v11 = vld [vmem:[#allocation12 + $0x28] sm:$0xff] }
  0x84   : > { %1071 = vmatpush.msra.mxu3 %v995_v57  ;;  %1031 = vmatpush.msra.mxu2 %v1018_v60 }
  0x85   : > { %550 = vmatpush.msra.mxu0 %v525_v12  ;;  %661 = vmatpush.msra.mxu1 %v525_v12 }
  0x86   : > { %1072 = vmatpush.msra.mxu3 %v994_v61  ;;  %1032 = vmatpush.msra.mxu2 %v1017_v63  ;;  %v2249_v63 = vld [vmem:[#allocation11 + $0x6] ss:$0 sm:$0xff] }
  0x87   : > { %551 = vmatpush.msra.mxu0 %v524_v13  ;;  %662 = vmatpush.msra.mxu1 %v524_v13  ;;  %v1013_v13 = vld [vmem:[#allocation14 + $0x20] sm:$0xff] }
  0x88   : > { %1073 = vmatpush.msra.mxu3 %v993_v0  ;;  %1033 = vmatpush.msra.mxu2 %v1016_v3 }
  0x89   : > { %552 = vmatpush.msra.mxu0 %v523_v14  ;;  %663 = vmatpush.msra.mxu1 %v523_v14  ;;  %v989_v14 = vld [vmem:[#allocation12 + $0x20] sm:$0xff] }
  0x8a   : > { %1074 = vmatpush.msra.mxu3 %v992_v4  ;;  %1034 = vmatpush.msra.mxu2 %v1015_v6  ;;  %v1003_v4 = vld [vmem:[%s2168_s19 + $0x10] sm:$0xff] }
  0x8b   : > { %553 = vmatpush.msra.mxu0 %v522_v15  ;;  %664 = vmatpush.msra.mxu1 %v522_v15 }
  0x8c   : > { %554 = vmatmul.f32.vlgmr.msra.gmra.mxu0 %v510_v16  ;;  %665 = vmatmul.f32.vlgmr.msra.gmra.mxu1 %v627_v20  ;;  %v1011_v20 = vld [vmem:[#allocation14 + $0x10] sm:$0xff] }
  0x8d   : > { %1075 = vmatpush.msra.mxu3 %v991_v7  ;;  %1035 = vmatpush.msra.mxu2 %v1014_v10 }
  0x8f   : > { %1076 = vmatpush.msra.mxu3 %v990_v11  ;;  %1036 = vmatpush.msra.mxu2 %v1013_v13 }
  0x91   : > { %1077 = vmatpush.msra.mxu3 %v989_v14 }
  0x94   : > { %557 = vmatmul.f32.gmra.mxu0 %v511_v17  ;;  %668 = vmatmul.f32.gmra.mxu1 %v628_v22  ;;  %v1012_v17 = vld [vmem:[#allocation14 + $0x18] sm:$0xff] }
  0x95   : > { %1037 = vmatpush.msra.mxu2 %v1012_v17 }
  0x97   : > { %1038 = vmatpush.msra.mxu2 %v1011_v20  ;;  %v2269_v20 = vld [vmem:[#allocation11 + $0x8] ss:$0 sm:$0xff] }
  0x9c   : > { %560 = vmatmul.f32.gmra.mxu0 %v512_v18  ;;  %671 = vmatmul.f32.gmra.mxu1 %v629_v24  ;;  %v988_v18 = vld [vmem:[#allocation12 + $0x18] sm:$0xff]  ;;  %v1010_v24 = vld [vmem:[#allocation14 + $0x8] sm:$0xff] }
  0x9d   : > { %1078 = vmatpush.msra.mxu3 %v988_v18  ;;  %1039 = vmatpush.msra.mxu2 %v1010_v24 }
  0xa4   : > { %563 = vmatmul.f32.gmra.mxu0 %v513_v19  ;;  %674 = vmatmul.f32.gmra.mxu1 %v630_v26 }
  0xac   : > { %566 = vmatmul.f32.gmra.mxu0 %v514_v21  ;;  %677 = vmatmul.f32.gmra.mxu1 %v631_v28  ;;  %v987_v21 = vld [vmem:[#allocation12 + $0x10] sm:$0xff]  ;;  %v985_v28 = vld [vmem:[#allocation12] sm:$0xff] }
  0xad   : > { %1079 = vmatpush.msra.mxu3 %v987_v21 }
  0xb4   : > { %569 = vmatmul.f32.gmra.mxu0 %v515_v23  ;;  %680 = vmatmul.f32.gmra.mxu1 %v632_v30 }
  0xbc   : > { %572 = vmatmul.f32.gmra.mxu0 %v516_v25  ;;  %v986_v25 = vld [vmem:[#allocation12 + $0x8] sm:$0xff] }
  0xbd   : > { %1080 = vmatpush.msra.mxu3 %v986_v25 }
  0xbf   : > { %1081 = vmatpush.msra.mxu3 %v985_v28 }
  0xc4   : > { %575 = vmatmul.f32.gmra.mxu0 %v517_v27  ;;  %v1009_v27 = vld [vmem:[#allocation14] sm:$0xff] }
  0xc5   : > { %1040 = vmatpush.msra.mxu2 %v1009_v27 }
  0xcc   : > { %578 = vmatmul.f32.gmra.mxu0 %v518_v29  ;;  %v2218_v29 = vld [vmem:[#allocation11 + $0x1] ss:$0 sm:$0xff] }
  0xd4   : > { %581 = vmatmul.f32.gmra.mxu0 %v519_v31  ;;  %v1001_v31 = vld [vmem:[%s2168_s19] sm:$0xff] }
  0xd5   : > { %1041 = vmatmul.f32.vlgmr.msra.gmra.mxu2 %v1001_v31 }
  0xdc   : > { %584 = vmatmul.f32.gmra.mxu0 %v520_v32 }
  0xdd   : > { %1044 = vmatmul.f32.gmra.mxu2 %v1002_v50 }
  0xe4   : > { %587 = vmatmul.f32.gmra.mxu0 %v521_v33 }
  0xe5   : > { %1047 = vmatmul.f32.gmra.mxu2 %v1003_v4 }
 0x109   : > { %v555_v34 = vpop.f32.mrf.mxu0  ;;  %v666_v58 = vpop.f32.mrf.mxu1 }
 0x10a   : > { %v591_v35 = vmax.f32 %v555_v34, 0.0  ;;  %v684_v59 = vmax.f32 %v666_v58, 0.0  ;;  %v2221_v34 = vld [vmem:[#allocation11] ss:$0 sm:$0xff] }
 0x10c   : > { %v2200_v36 = vmin.f32 %v591_v35, 6.0  ;;  %v2209_v62 = vmin.f32 %v684_v59, 6.0  ;;  %v2246_v59 = vld [vmem:[#allocation11 + $0x5] ss:$0 sm:$0xff] }
 0x10e   : > { %615 = vst [vmem:[#allocation2] sm:$0xff] %v2200_v36 }
 0x10f   : > { %697 = vst [vmem:[#allocation2 + $0x60] sm:$0xff] %v2209_v62 }
 0x111   : > { %v558_v37 = vpop.f32.mrf.mxu0  ;;  %v669_v8 = vpop.f32.mrf.mxu1 }
 0x112   : > { %v592_v38 = vmax.f32 %v558_v37, 0.0  ;;  %v685_v9 = vmax.f32 %v669_v8, 0.0 }
 0x114   : > { %v2203_v39 = vmin.f32 %v592_v38, 6.0  ;;  %v2215_v12 = vmin.f32 %v685_v9, 6.0 }
 0x116   : > { %616 = vst [vmem:[#allocation2 + $0x8] sm:$0xff] %v2203_v39  ;;  %v716_v0 = vmul.f32 %v2221_v34, %v2203_v39  ;;  %v2259_v13 = vmul.f32 %v2231_v42, %v2215_v12 }
 0x117   : > { %698 = vst [vmem:[#allocation2 + $0x68] sm:$0xff] %v2215_v12 }
 0x119   : > { %v561_v40 = vpop.f32.mrf.mxu0  ;;  %v672_v22 = vpop.f32.mrf.mxu1 }
 0x11a   : > { %v593_v41 = vmax.f32 %v561_v40, 0.0  ;;  %v686_v23 = vmax.f32 %v672_v22, 0.0  ;;  %v715_v40 = vmul.f32 %v2221_v34, %v2200_v36 }
 0x11c   : > { %v605_v44 = vmin.f32 %v593_v41, 6.0  ;;  %v692_v26 = vmin.f32 %v686_v23, 6.0  ;;  %v2229_v41 = vld [vmem:[#allocation11 + $0x2] ss:$0 sm:$0xff] }
 0x11d   : > { %v723_v32 = vld [vmem:[#allocation2 + $0x1] sm:$0xff] }
 0x11e   : > { %617 = vst [vmem:[#allocation2 + $0x10] sm:$0xff] %v605_v44  ;;  %v736_v37 = vmul.f32 %v2218_v29, %v723_v32  ;;  %v752_v44 = vld [vmem:[#allocation2 + $0x2] sm:$0xff] }
 0x11f   : > { %699 = vst [vmem:[#allocation2 + $0x70] sm:$0xff] %v692_v26  ;;  %v765_v53 = vmul.f32 %v2229_v41, %v752_v44 }
 0x120   : > { %v744_v45 = vadd.f32 %v736_v37, %v715_v40  ;;  %v2280_v37 = vld [vmem:[%s2510_s29] ss:$0 sm:$0xff] }
 0x121   : > { %v564_v51 = vpop.f32.mrf.mxu0  ;;  %v675_v38 = vpop.f32.mrf.mxu1 }
 0x122   : > { %v594_v52 = vmax.f32 %v564_v51, 0.0  ;;  %v687_v43 = vmax.f32 %v675_v38, 0.0  ;;  %v773_v56 = vadd.f32 %v765_v53, %v744_v45 }
 0x124   : > { %v2206_v55 = vmin.f32 %v594_v52, 6.0  ;;  %v2235_v47 = vmin.f32 %v687_v43, 6.0 }
 0x125   : > { %v724_v51 = vld [vmem:[#allocation2 + $0x9] sm:$0xff] }
 0x126   : > { %618 = vst [vmem:[#allocation2 + $0x18] sm:$0xff] %v2206_v55  ;;  %v795_v36 = vmul.f32 %v2231_v42, %v2206_v55  ;;  %v737_v58 = vmul.f32 %v2218_v29, %v724_v51  ;;  %v1004_v51 = vld [vmem:[%s2168_s19 + $0x18] sm:$0xff] }
 0x127   : > { %700 = vst [vmem:[#allocation2 + $0x78] sm:$0xff] %v2235_v47  ;;  %1050 = vmatmul.f32.gmra.mxu2 %v1004_v51 }
 0x128   : > { %v803_v61 = vadd.f32 %v795_v36, %v773_v56  ;;  %v745_v7 = vadd.f32 %v737_v58, %v716_v0 }
 0x129   : > { %v567_v1 = vpop.f32.mrf.mxu0  ;;  %v678_v60 = vpop.f32.mrf.mxu1 }
 0x12a   : > { %v595_v2 = vmax.f32 %v567_v1, 0.0  ;;  %v753_v1 = vld [vmem:[#allocation2 + $0xa] sm:$0xff] }
 0x12b   : > { %v766_v10 = vmul.f32 %v2229_v41, %v753_v1 }
 0x12c   : > { %v2212_v5 = vmin.f32 %v595_v2, 6.0  ;;  %v688_v2 = vmax.f32 %v678_v60, 0.0  ;;  %v717_v60 = vmul.f32 %v2221_v34, %v2206_v55 }
 0x12d   : > { %v774_v21 = vadd.f32 %v766_v10, %v745_v7 }
 0x12e   : > { %619 = vst [vmem:[#allocation2 + $0x20] sm:$0xff] %v2212_v5  ;;  %v2254_v8 = vmin.f32 %v688_v2, 6.0  ;;  %v796_v17 = vmul.f32 %v2231_v42, %v2212_v5 }
 0x130   : > { %701 = vst [vmem:[#allocation2 + $0x80] sm:$0xff] %v2254_v8  ;;  %v804_v28 = vadd.f32 %v796_v17, %v774_v21 }
 0x131   : > { %v570_v15 = vpop.f32.mrf.mxu0  ;;  %v681_v25 = vpop.f32.mrf.mxu1 }
 0x132   : > { %v596_v16 = vmax.f32 %v570_v15, 0.0 }
 0x134   : > { %v608_v19 = vmin.f32 %v596_v16, 6.0  ;;  %v2264_v16 = vld [vmem:[#allocation11 + $0x7] ss:$0 sm:$0xff] }
 0x135   : > { %v811_v49 = vld [vmem:[#allocation2 + $0x19] sm:$0xff] }
 0x136   : > { %620 = vst [vmem:[#allocation2 + $0x28] sm:$0xff] %v608_v19  ;;  %v824_v57 = vmul.f32 %v2233_v46, %v811_v49  ;;  %v840_v3 = vld [vmem:[#allocation2 + $0x1a] sm:$0xff] }
 0x137   : > { %v853_v15 = vmul.f32 %v2246_v59, %v840_v3 }
 0x138   : > { %v832_v6 = vadd.f32 %v824_v57, %v803_v61 }
 0x139   : > { %v573_v30 = vpop.f32.mrf.mxu0 }
 0x13a   : > { %v597_v33 = vmax.f32 %v573_v30, 0.0  ;;  %v861_v19 = vadd.f32 %v853_v15, %v832_v6  ;;  %v689_v30 = vmax.f32 %v681_v25, 0.0  ;;  %v1005_v15 = vld [vmem:[%s2168_s19 + $0x20] sm:$0xff]  ;;  %v718_v25 = vmul.f32 %v2221_v34, %v2212_v5 }
 0x13b   : > { %1053 = vmatmul.f32.gmra.mxu2 %v1005_v15  ;;  %v903_v15 = vld [vmem:[#allocation2 + $0x61] sm:$0xff] }
 0x13c   : > { %v2223_v35 = vmin.f32 %v597_v33, 6.0  ;;  %v695_v40 = vmin.f32 %v689_v30, 6.0 }
 0x13d   : > { %v812_v11 = vld [vmem:[#allocation2 + $0x21] sm:$0xff] }
 0x13e   : > { %621 = vst [vmem:[#allocation2 + $0x30] sm:$0xff] %v2223_v35  ;;  %v883_v39 = vmul.f32 %v2249_v63, %v2223_v35  ;;  %v825_v22 = vmul.f32 %v2233_v46, %v812_v11  ;;  %v841_v31 = vld [vmem:[#allocation2 + $0x22] sm:$0xff]  ;;  %v797_v55 = vmul.f32 %v2231_v42, %v2223_v35  ;;  %v739_v17 = vmul.f32 %v2218_v29, %v812_v11 }
 0x13f   : > { %702 = vst [vmem:[#allocation2 + $0x88] sm:$0xff] %v695_v40 }
 0x140   : > { %v891_v26 = vadd.f32 %v883_v39, %v861_v19  ;;  %v833_v38 = vadd.f32 %v825_v22, %v804_v28 }
 0x141   : > { %v576_v48 = vpop.f32.mrf.mxu0 }
 0x142   : > { %v598_v52 = vmax.f32 %v576_v48, 0.0  ;;  %v854_v48 = vmul.f32 %v2246_v59, %v841_v31 }
 0x144   : > { %v2242_v54 = vmin.f32 %v598_v52, 6.0  ;;  %v738_v52 = vmul.f32 %v2218_v29, %v811_v49  ;;  %v862_v56 = vadd.f32 %v854_v48, %v833_v38 }
 0x146   : > { %622 = vst [vmem:[#allocation2 + $0x38] sm:$0xff] %v2242_v54  ;;  %v884_v50 = vmul.f32 %v2249_v63, %v2242_v54  ;;  %v746_v49 = vadd.f32 %v738_v52, %v717_v60  ;;  %v798_v5 = vmul.f32 %v2231_v42, %v2242_v54 }
 0x148   : > { %v892_v0 = vadd.f32 %v884_v50, %v862_v56 }
 0x149   : > { %v579_v9 = vpop.f32.mrf.mxu0 }
 0x14a   : > { %v599_v14 = vmax.f32 %v579_v9, 0.0  ;;  %v767_v9 = vmul.f32 %v2229_v41, %v840_v3 }
 0x14c   : > { %v611_v18 = vmin.f32 %v599_v14, 6.0  ;;  %v775_v39 = vadd.f32 %v767_v9, %v746_v49 }
 0x14d   : > { %v899_v23 = vld [vmem:[#allocation2 + $0x31] sm:$0xff] }
 0x14e   : > { %v2272_v24 = vld [vmem:[#allocation2 + $0x32] sm:$0xff]  ;;  %623 = vst [vmem:[#allocation2 + $0x40] sm:$0xff] %v611_v18  ;;  %v912_v27 = vmul.f32 %v2264_v16, %v899_v23  ;;  %v2305_v18 = vmul.f32 %v2249_v63, %v2254_v8  ;;  %v826_v3 = vmul.f32 %v2233_v46, %v899_v23  ;;  %v740_v22 = vmul.f32 %v2218_v29, %v899_v23 }
 0x14f   : > { %v941_v33 = vmul.f32 %v2269_v20, %v2272_v24  ;;  %v805_v11 = vadd.f32 %v797_v55, %v775_v39  ;;  %v719_v8 = vmul.f32 %v2221_v34, %v2223_v35  ;;  %v855_v38 = vmul.f32 %v2246_v59, %v2272_v24 }
 0x150   : > { %v920_v32 = vadd.f32 %v912_v27, %v891_v26  ;;  %v747_v27 = vadd.f32 %v739_v17, %v718_v25  ;;  %v768_v23 = vmul.f32 %v2229_v41, %v841_v31  ;;  %v769_v35 = vmul.f32 %v2229_v41, %v2272_v24 }
 0x151   : > { %v582_v43 = vpop.f32.mrf.mxu0  ;;  %v834_v30 = vadd.f32 %v826_v3, %v805_v11  ;;  %v720_v24 = vmul.f32 %v2221_v34, %v2242_v54 }
 0x152   : > { %v600_v44 = vmax.f32 %v582_v43, 0.0  ;;  %v949_v45 = vadd.f32 %v941_v33, %v920_v32  ;;  %v748_v32 = vadd.f32 %v740_v22, %v719_v8  ;;  %v776_v48 = vadd.f32 %v768_v23, %v747_v27  ;;  %v1007_v8 = vld [vmem:[%s2168_s19 + $0x30] sm:$0xff] }
 0x153   : > { %v863_v52 = vadd.f32 %v855_v38, %v834_v30  ;;  %v916_v27 = vmul.f32 %v2264_v16, %v903_v15  ;;  %v830_v30 = vmul.f32 %v2233_v46, %v903_v15 }
 0x154   : > { %v2287_v53 = vmin.f32 %v600_v44, 6.0  ;;  %v961_v36 = vadd.f32 %v2280_v37, %v949_v45  ;;  %v1006_v45 = vld [vmem:[%s2168_s19 + $0x28] sm:$0xff] }
 0x155   : > { %v900_v57 = vld [vmem:[#allocation2 + $0x39] sm:$0xff]  ;;  %1056 = vmatmul.f32.gmra.mxu2 %v1006_v45 }
 0x156   : > { %v2290_v58 = vld [vmem:[#allocation2 + $0x3a] sm:$0xff]  ;;  %624 = vst [vmem:[#allocation2 + $0x48] sm:$0xff] %v2287_v53  ;;  %v969_v61 = vmax.f32 %v961_v36, 0.0  ;;  %v913_v1 = vmul.f32 %v2264_v16, %v900_v57  ;;  %v885_v43 = vmul.f32 %v2249_v63, %v2287_v53  ;;  %v799_v44 = vmul.f32 %v2231_v42, %v2287_v53 }
 0x157   : > { %v942_v6 = vmul.f32 %v2269_v20, %v2290_v58  ;;  %v827_v50 = vmul.f32 %v2233_v46, %v900_v57  ;;  %v741_v31 = vmul.f32 %v2218_v29, %v900_v57  ;;  %v777_v36 = vadd.f32 %v769_v35, %v748_v32 }
 0x158   : > { %v977_v2 = vmin.f32 %v969_v61, 6.0  ;;  %v921_v4 = vadd.f32 %v913_v1, %v892_v0  ;;  %v806_v61 = vadd.f32 %v798_v5, %v776_v48  ;;  %v887_v0 = vmul.f32 %v2249_v63, %v2209_v62 }
 0x159   : > { %v585_v7 = vpop.f32.mrf.mxu0  ;;  %v893_v1 = vadd.f32 %v885_v43, %v863_v52  ;;  %v856_v39 = vmul.f32 %v2246_v59, %v2290_v58  ;;  %v770_v17 = vmul.f32 %v2229_v41, %v2290_v58  ;;  %v801_v58 = vmul.f32 %v2231_v42, %v2209_v62 }
 0x15a   : > { %v601_v10 = vmax.f32 %v585_v7, 0.0  ;;  %1082 = vmatmul.f32.vlgmr.msra.gmra.mxu3 %v977_v2  ;;  %v950_v14 = vadd.f32 %v942_v6, %v921_v4  ;;  %v807_v2 = vadd.f32 %v799_v44, %v777_v36  ;;  %v835_v57 = vadd.f32 %v827_v50, %v806_v61 }
 0x15b   : > { %v749_v6 = vadd.f32 %v741_v31, %v720_v24  ;;  %v721_v7 = vmul.f32 %v2221_v34, %v2287_v53  ;;  %v889_v44 = vmul.f32 %v2249_v63, %v2235_v47 }
 0x15c   : > { %v2307_v19 = vmin.f32 %v601_v10, 6.0  ;;  %v962_v21 = vadd.f32 %v2280_v37, %v950_v14 }
 0x15d   : > { %1059 = vmatmul.f32.gmra.mxu2 %v1007_v8  ;;  %v778_v23 = vadd.f32 %v770_v17, %v749_v6  ;;  %v906_v17 = vld [vmem:[#allocation2 + $0x81] sm:$0xff] }
 0x15e   : > { %625 = vst [vmem:[#allocation2 + $0x50] sm:$0xff] %v2307_v19  ;;  %v970_v26 = vmax.f32 %v962_v21, 0.0  ;;  %v886_v22 = vmul.f32 %v2249_v63, %v2307_v19  ;;  %v800_v11 = vmul.f32 %v2231_v42, %v2307_v19  ;;  %v722_v45 = vmul.f32 %v2221_v34, %v2307_v19 }
 0x160   : > { %v978_v28 = vmin.f32 %v970_v26, 6.0  ;;  %v932_v26 = vld [vmem:[#allocation2 + $0x62] sm:$0xff]  ;;  %v808_v50 = vadd.f32 %v800_v11, %v778_v23  ;;  %v919_v11 = vmul.f32 %v2264_v16, %v906_v17 }
 0x161   : > { %v588_v33 = vpop.f32.mrf.mxu0  ;;  %v859_v35 = vmul.f32 %v2246_v59, %v932_v26 }
 0x162   : > { %v602_v40 = vmax.f32 %v588_v33, 0.0  ;;  %1085 = vmatmul.f32.gmra.mxu3 %v978_v28  ;;  %v864_v33 = vadd.f32 %v856_v39, %v835_v57 }
 0x164   : > { %v614_v51 = vmin.f32 %v602_v40, 6.0  ;;  %v894_v62 = vadd.f32 %v886_v22, %v864_v33  ;;  %v935_v22 = vld [vmem:[#allocation2 + $0x82] sm:$0xff] }
 0x165   : > { %v901_v56 = vld [vmem:[#allocation2 + $0x49] sm:$0xff]  ;;  %v948_v8 = vmul.f32 %v2269_v20, %v935_v22 }
 0x166   : > { %v930_v60 = vld [vmem:[#allocation2 + $0x4a] sm:$0xff]  ;;  %626 = vst [vmem:[#allocation2 + $0x58] sm:$0xff] %v614_v51  ;;  %v914_v49 = vmul.f32 %v2264_v16, %v901_v56  ;;  %v828_v4 = vmul.f32 %v2233_v46, %v901_v56  ;;  %v742_v9 = vmul.f32 %v2218_v29, %v901_v56 }
 0x167   : > { %v943_v14 = vmul.f32 %v2269_v20, %v930_v60  ;;  %v857_v54 = vmul.f32 %v2246_v59, %v930_v60  ;;  %v771_v3 = vmul.f32 %v2229_v41, %v930_v60 }
 0x168   : > { %v922_v10 = vadd.f32 %v914_v49, %v893_v1  ;;  %v836_v55 = vadd.f32 %v828_v4, %v807_v2  ;;  %v750_v21 = vadd.f32 %v742_v9, %v721_v7  ;;  %v945_v49 = vmul.f32 %v2269_v20, %v932_v26  ;;  %v904_v2 = vld [vmem:[#allocation2 + $0x69] sm:$0xff] }
 0x169   : > { %v1008_v4 = vld [vmem:[%s2168_s19 + $0x38] sm:$0xff]  ;;  %v917_v39 = vmul.f32 %v2264_v16, %v904_v2 }
 0x16a   : > { %v951_v53 = vadd.f32 %v943_v14, %v922_v10  ;;  %v865_v25 = vadd.f32 %v857_v54, %v836_v55  ;;  %v779_v28 = vadd.f32 %v771_v3, %v750_v21  ;;  %1062 = vmatmul.f32.gmra.mxu2 %v1008_v4  ;;  %v933_v14 = vld [vmem:[#allocation2 + $0x6a] sm:$0xff]  ;;  %v831_v54 = vmul.f32 %v2233_v46, %v904_v2 }
 0x16b   : > { %v860_v3 = vmul.f32 %v2246_v59, %v933_v14 }
 0x16c   : > { %v963_v32 = vadd.f32 %v2280_v37, %v951_v53  ;;  %v895_v38 = vadd.f32 %v887_v0, %v865_v25  ;;  %v809_v43 = vadd.f32 %v801_v58, %v779_v28  ;;  %v905_v25 = vld [vmem:[#allocation2 + $0x79] sm:$0xff] }
 0x16d   : > { %v902_v5 = vld [vmem:[#allocation2 + $0x51] sm:$0xff]  ;;  %v934_v58 = vld [vmem:[#allocation2 + $0x7a] sm:$0xff] }
 0x16e   : > { %v931_v40 = vld [vmem:[#allocation2 + $0x52] sm:$0xff]  ;;  %v971_v48 = vmax.f32 %v963_v32, 0.0  ;;  %v915_v42 = vmul.f32 %v2264_v16, %v902_v5  ;;  %v829_v51 = vmul.f32 %v2233_v46, %v902_v5  ;;  %v838_v52 = vadd.f32 %v830_v30, %v809_v43 }
 0x16f   : > { %v944_v31 = vmul.f32 %v2269_v20, %v931_v40  ;;  %v743_v36 = vmul.f32 %v2218_v29, %v902_v5  ;;  %v924_v61 = vadd.f32 %v916_v27, %v895_v38  ;;  %v858_v47 = vmul.f32 %v2246_v59, %v931_v40 }
 0x170   : > { %v979_v56 = vmin.f32 %v971_v48, 6.0  ;;  %v923_v60 = vadd.f32 %v915_v42, %v894_v62  ;;  %v837_v0 = vadd.f32 %v829_v51, %v808_v50  ;;  %v867_v34 = vadd.f32 %v859_v35, %v838_v52  ;;  %v1042_v42 = vpop.f32.mrf.mxu2 }
 0x171   : > { %v751_v19 = vadd.f32 %v743_v36, %v722_v45  ;;  %v772_v24 = vmul.f32 %v2229_v41, %v931_v40  ;;  %v888_v29 = vmul.f32 %v2249_v63, %v2215_v12  ;;  %v953_v10 = vadd.f32 %v945_v49, %v924_v61 }
 0x172   : > { %1088 = vmatmul.f32.gmra.mxu3 %v979_v56  ;;  %v952_v1 = vadd.f32 %v944_v31, %v923_v60  ;;  %v866_v57 = vadd.f32 %v858_v47, %v837_v0  ;;  %v897_v6 = vadd.f32 %v889_v44, %v867_v34  ;;  %v918_v59 = vmul.f32 %v2264_v16, %v905_v25 }
 0x173   : > { %v780_v7 = vadd.f32 %v772_v24, %v751_v19  ;;  %v965_v63 = vadd.f32 %v2280_v37, %v953_v10  ;;  %v947_v5 = vmul.f32 %v2269_v20, %v934_v58 }
 0x174   : > { %v964_v9 = vadd.f32 %v2280_v37, %v952_v1  ;;  %v896_v55 = vadd.f32 %v888_v29, %v866_v57  ;;  %v926_v23 = vadd.f32 %v918_v59, %v897_v6 }
 0x175   : > { %v810_v41 = vadd.f32 %v2259_v13, %v780_v7  ;;  %v946_v13 = vmul.f32 %v2269_v20, %v933_v14  ;;  %v973_v27 = vmax.f32 %v965_v63, 0.0 }
 0x176   : > { %v972_v15 = vmax.f32 %v964_v9, 0.0  ;;  %v925_v53 = vadd.f32 %v917_v39, %v896_v55  ;;  %v955_v43 = vadd.f32 %v947_v5, %v926_v23 }
 0x177   : > { %v839_v21 = vadd.f32 %v831_v54, %v810_v41  ;;  %v981_v33 = vmin.f32 %v973_v27, 6.0 }
 0x178   : > { %v980_v12 = vmin.f32 %v972_v15, 6.0  ;;  %v954_v28 = vadd.f32 %v946_v13, %v925_v53  ;;  %v967_v44 = vadd.f32 %v2280_v37, %v955_v43  ;;  %v1045_v20 = vpop.f32.mrf.mxu2 }
 0x179   : > { %v868_v26 = vadd.f32 %v860_v3, %v839_v21 }
 0x17a   : > { %1091 = vmatmul.f32.gmra.mxu3 %v980_v12  ;;  %v966_v38 = vadd.f32 %v2280_v37, %v954_v28  ;;  %v975_v16 = vmax.f32 %v967_v44, 0.0 }
 0x17b   : > { %v898_v46 = vadd.f32 %v2305_v18, %v868_v26 }
 0x17c   : > { %v974_v18 = vmax.f32 %v966_v38, 0.0  ;;  %v983_v45 = vmin.f32 %v975_v16, 6.0 }
 0x17d   : > { %v927_v30 = vadd.f32 %v919_v11, %v898_v46 }
 0x17e   : > { %v982_v35 = vmin.f32 %v974_v18, 6.0 }
 0x17f   : > { %v956_v32 = vadd.f32 %v948_v8, %v927_v30 }
 0x180   : > { %v1048_v52 = vpop.f32.mrf.mxu2 }
 0x181   : > { %v968_v40 = vadd.f32 %v2280_v37, %v956_v32 }
 0x182   : > { %1094 = vmatmul.f32.gmra.mxu3 %v981_v33 }
 0x183   : > { %v976_v48 = vmax.f32 %v968_v40, 0.0 }
 0x185   : > { %v984_v62 = vmin.f32 %v976_v48, 6.0 }
 0x18a   : > { %1097 = vmatmul.f32.gmra.mxu3 %v982_v35 }
 0x192   : > { %1100 = vmatmul.f32.gmra.mxu3 %v983_v45 }
 0x19a   : > { %1103 = vmatmul.f32.gmra.mxu3 %v984_v62 }
 0x1aa   : > { %v1051_v36 = vpop.f32.mrf.mxu2 }
 0x1be   : > { %v1054_v47 = vpop.f32.mrf.mxu2 }
 0x1d8   : > { %v1057_v24 = vpop.f32.mrf.mxu2 }
 0x1dd   : > { %v1083_v50 = vpop.f32.mrf.mxu3 }
 0x1de   : > { %v1084_v31 = vadd.f32 %v1083_v50, %v1042_v42 }
 0x1e0   : > { %1107 = vst [vmem:[%s2389_s3] sm:$0xff] %v1084_v31  ;;  %v1060_v2 = vpop.f32.mrf.mxu2 }
 0x1e5   : > { %v1086_v37 = vpop.f32.mrf.mxu3 }
 0x1e6   : > { %v1087_v51 = vadd.f32 %v1086_v37, %v1045_v20 }
 0x1e8   : > { %1108 = vst [vmem:[%s2389_s3 + $0x8] sm:$0xff] %v1087_v51 }
 0x1ed   : > { %v1063_v29 = vpop.f32.mrf.mxu2 }
 0x1f5   : > { %v1089_v56 = vpop.f32.mrf.mxu3 }
 0x1f6   : > { %v1090_v60 = vadd.f32 %v1089_v56, %v1048_v52 }
 0x1f8   : > { %1109 = vst [vmem:[%s2389_s3 + $0x10] sm:$0xff] %v1090_v60 }
 0x1fd   : > { %v1092_v61 = vpop.f32.mrf.mxu3 }
 0x1fe   : > { %v1093_v0 = vadd.f32 %v1092_v61, %v1051_v36 }
 0x200   : > { %1110 = vst [vmem:[%s2389_s3 + $0x18] sm:$0xff] %v1093_v0 }
 0x205   : > { %v1095_v34 = vpop.f32.mrf.mxu3 }
 0x206   : > { %v1096_v19 = vadd.f32 %v1095_v34, %v1054_v47 }
 0x208   : > { %1111 = vst [vmem:[%s2389_s3 + $0x20] sm:$0xff] %v1096_v19 }
 0x20d   : > { %v1098_v1 = vpop.f32.mrf.mxu3 }
 0x20e   : > { %v1099_v49 = vadd.f32 %v1098_v1, %v1057_v24 }
 0x210   : > { %1112 = vst [vmem:[%s2389_s3 + $0x28] sm:$0xff] %v1099_v49 }
 0x215   : > { %v1101_v4 = vpop.f32.mrf.mxu3 }
 0x216   : > { %v1102_v57 = vadd.f32 %v1101_v4, %v1060_v2 }
 0x218   : > { %1113 = vst [vmem:[%s2389_s3 + $0x30] sm:$0xff] %v1102_v57 }
 0x21d   : > { %v1104_v6 = vpop.f32.mrf.mxu3 }
 0x21e   : > { %v1105_v7 = vadd.f32 %v1104_v6, %v1063_v29 }
 0x220   : > { %1114 = vst [vmem:[%s2389_s3 + $0x38] sm:$0xff] %v1105_v7 }
 0x221   : > { %1757 = shalt.err (!%p1754_p9)
}
 0x222   : > { %s1878_s1 = smov 128   ;;  %s1879_s3 = smov 8  }
 0x223   : > { %1373 = dma.vmem_to_hbm [thread:$0]  (%p2102_p12), %s1132_s22, 1024, %s1134_s28, %s1116_s17, %s1878_s1, %s1878_s1, %s1879_s3  }
 0x224 PF: > { %p1411_p10 = scmp.ge.s32.totalorder %s1868_s15, 2  ;;  %s1148_s6 = sand.u32 1, %s1840_s30  }
 0x225   : > { %s1149_s27 = scalar_lea.sflag [#allocation5], %s1148_s6 }
 0x226   : > { %p1399_p11 = pnand %p1411_p10, %p2113_p6 }
 0x228   : > { %p1400_p5 = pneg %p1399_p11 }
 0x22a   : > { %1823 = dma.done.wait (%p1400_p5), %s1149_s27, 1024  }
 0x22b   : > { %1825 = vsyncadd (%p1400_p5), %s1149_s27, 4294966272  ;;  %s29_s15 = sadd.s32 1, %s1868_s15   ;;  %s2514_s27 = sld [smem:[#allocation22_spill]] }
 0x22c   : > { %p26_p7 = scmp.ge.s32.totalorder %s29_s15, 10   ;;  %s2515_s28 = sld [smem:[#allocation23_spill]] }
 0x22d   : > { %s2516_s29 = sld [smem:[#allocation30_spill]]  ;;  %s2519_s30 = smov %s1844_s9 }
 0x22e   : > { %s2517_s21 = sld [smem:[#allocation27_spill]]  ;;  %s2520_s9 = smov %s1848_s10 }
 0x22f   : > { %s2518_s25 = sld [smem:[#allocation28_spill]]  ;;  %s2521_s10 = smov %s2094_s12 }
 0x230   : > { %s2522_s11 = smov %s1860_s13  ;;  %s2523_s12 = smov %s1864_s14 }
 0x231   :  { %28 = sbr.rel (!%p26_p7) target bundleno = 22 (0x16), region = 148 }
 0x234   : > { %s2524_s13 = smov %s2517_s21 }
 0x235   : > { %s2525_s14 = smov %s2518_s25 }
 0x236   :  { %1155 = vsyncpa [#allocation4], 1 }
 0x237   :  { %1157 = vsyncpa [#allocation4 + $0x1], 1 }
 0x238   :  { %1158 = vsyncpa [#allocation7], 1 }
 0x239   :  { %1160 = vsyncpa [#allocation7 + $0x1], 1 }
 0x23a   :  { %1161 = vsyncpa [#allocation10], 1 }
 0x23b   :  { %1162 = vsyncpa [#allocation13], 1 }
 0x23c   :  { %1163 = vsyncpa [#allocation5], 1 }
 0x23d   :  { %1165 = vsyncpa [#allocation5 + $0x1], 1 }

</bundles_post_ra>
